<compile_context>
chip_gen: v7x
topology: tpu7x:2x2x1
jax: 0.10.0
libtpu: 0.0.40
codegen_flags: <defaults>
</compile_context>

<pallas_src>
import functools
import math

import jax
import jax.numpy as jnp
import numpy as np
from jax.experimental import pallas as pl
from jax.experimental.pallas import tpu as pltpu

LN_EPS = 1e-5


def _layer_norm(x, gamma, beta):
    mu = jnp.mean(x, axis=-1, keepdims=True)
    var = jnp.mean((x - mu) ** 2, axis=-1, keepdims=True)
    return (x - mu) * jax.lax.rsqrt(var + LN_EPS) * gamma + beta


# ----------------------------- fused Pallas kernel ---------------------------

def _fused_kernel(x0_ref,
                  wqkv_ref, bqkv_ref, wo_ref, bo_ref,
                  ln1g_ref, ln1b_ref, ln2g_ref, ln2b_ref,
                  w1_ref, b1_ref, w2_ref, b2_ref,
                  lnfg_ref, lnfb_ref, wh_ref, bh_ref,
                  out_ref, x_scr,
                  *, batch, seq, num_heads, head_dim, num_layers):
    l = pl.program_id(0)
    C = num_heads * head_dim
    M = batch * seq

    # Load embeddings + PE into the resident VMEM residual stream on the first step.
    @pl.when(l == 0)
    def _():
        x_scr[...] = x0_ref[...]

    x = x_scr[...]                                           # (M, C) f32

    # ---- self-attention branch: x = x + attn(ln1(x)) ----
    x2 = _layer_norm(x, ln1g_ref[0], ln1b_ref[0])            # f32
    qkv = jnp.dot(x2.astype(jnp.bfloat16), wqkv_ref[0],
                  preferred_element_type=jnp.float32) + bqkv_ref[0]      # (M, 3C) f32
    q = qkv[:, 0 * C:1 * C].reshape(batch, seq, C).astype(jnp.bfloat16)
    k = qkv[:, 1 * C:2 * C].reshape(batch, seq, C).astype(jnp.bfloat16)
    v = qkv[:, 2 * C:3 * C].reshape(batch, seq, C).astype(jnp.bfloat16)

    wo = wo_ref[0]                                           # (C, C) bf16, hoisted
    scale = 1.0 / math.sqrt(head_dim)
    attn = jnp.zeros((M, C), jnp.float32)
    for h in range(num_heads):                               # static, unrolled (H=4)
        sl = slice(h * head_dim, (h + 1) * head_dim)
        # batched over B in one dot_general per head
        s = jnp.einsum('bqd,bkd->bqk', q[:, :, sl], k[:, :, sl],
                       preferred_element_type=jnp.float32) * scale      # (B, T, T) f32
        s = s - jnp.max(s, axis=-1, keepdims=True)
        p = jnp.exp(s)
        p = p * pl.reciprocal(jnp.sum(p, axis=-1, keepdims=True), approx=True)
        oh = jnp.einsum('bqk,bkd->bqd', p.astype(jnp.bfloat16), v[:, :, sl],
                        preferred_element_type=jnp.float32)             # (B, T, hd)
        # fold this head's output straight into the output projection accumulator
        attn = attn + jnp.dot(oh.reshape(M, head_dim).astype(jnp.bfloat16),
                              wo[sl, :], preferred_element_type=jnp.float32)
    x = x + attn + bo_ref[0]                                 # dropout == identity

    # ---- MLP branch: x = x + mlp(ln2(x)) ----
    x2 = _layer_norm(x, ln2g_ref[0], ln2b_ref[0])
    h1 = jnp.dot(x2.astype(jnp.bfloat16), w1_ref[0],
                 preferred_element_type=jnp.float32) + b1_ref[0]
    h1 = jnp.maximum(h1, 0.0)
    mlp = jnp.dot(h1.astype(jnp.bfloat16), w2_ref[0],
                  preferred_element_type=jnp.float32) + b2_ref[0]
    x = x + mlp
    x_scr[...] = x

    # ---- final LN + LM head, only on the last layer step ----
    @pl.when(l == num_layers - 1)
    def _():
        xn = _layer_norm(x, lnfg_ref[...], lnfb_ref[...])
        out_ref[...] = jnp.dot(xn.astype(jnp.bfloat16), wh_ref[...],
                               preferred_element_type=jnp.float32) + bh_ref[...]


# ----------------------------- wrapper ---------------------------------------

def forward(idx, params):
    B, T = idx.shape
    C = params["emb"].shape[1]
    V = params["wh"].shape[1]
    H = params["num_heads"]
    L = params["wqkv"].shape[0]
    M = B * T

    # Token-embedding gather + positional encoding: plain-JAX glue, then flatten B*T.
    x0 = (params["emb"][idx] + params["pe"][None, :T, :]).reshape(M, C)

    bf16 = lambda a: a.astype(jnp.bfloat16)
    weights = [
        bf16(params["wqkv"]), params["bqkv"], bf16(params["wo"]), params["bo"],
        params["ln1g"], params["ln1b"], params["ln2g"], params["ln2b"],
        bf16(params["w1"]), params["b1"], bf16(params["w2"]), params["b2"],
        params["lnfg"], params["lnfb"], bf16(params["wh"]), params["bh"],
    ]

    def layer_spec(shape):
        rank = len(shape)
        return pl.BlockSpec((1,) + tuple(shape[1:]),
                            lambda l, _r=rank: (l,) + (0,) * (_r - 1))

    def full_spec(shape):
        rank = len(shape)
        return pl.BlockSpec(tuple(shape), lambda l, _r=rank: (0,) * _r)

    in_specs = [full_spec(x0.shape)]
    in_specs += [layer_spec(w.shape) for w in weights[:12]]   # stacked per-layer
    in_specs += [full_spec(w.shape) for w in weights[12:]]    # shared final LN / head

    out = pl.pallas_call(
        functools.partial(_fused_kernel, batch=B, seq=T, num_heads=H,
                          head_dim=C // H, num_layers=L),
        out_shape=jax.ShapeDtypeStruct((M, V), jnp.float32),
        grid=(L,),
        in_specs=in_specs,
        out_specs=pl.BlockSpec((M, V), lambda l: (0, 0)),     # resident across layer axis
        scratch_shapes=[pltpu.VMEM((M, C), jnp.float32)],     # residual stream
        compiler_params=pltpu.CompilerParams(
            dimension_semantics=("arbitrary",)),
    )(x0, *weights)
    # TODO(synk): on v7x, add an outer "parallel" batch/row-tile grid axis so both
    # TensorCores get work; at this toy size a single-core schedule is used.
    return out.reshape(B, T, V)


# ----------------------------- params / PE ------------------------------------

def positional_encoding(max_len, d_model):
    pos = jnp.arange(max_len, dtype=jnp.float32)[:, None]
    div = jnp.exp(jnp.arange(0, d_model, 2, dtype=jnp.float32) *
                  (-math.log(10000.0) / d_model))
    pe = jnp.zeros((max_len, d_model), dtype=jnp.float32)
    pe = pe.at[:, 0::2].set(jnp.sin(pos * div))
    pe = pe.at[:, 1::2].set(jnp.cos(pos * div))
    return pe


def init_params(key, *, vocab, embed_dim, num_heads, num_layers, mlp_dim, max_len):
    C, Mm, L = embed_dim, mlp_dim, num_layers
    scale = 0.05

    def nrm(k, shape):
        return scale * jax.random.normal(k, shape, dtype=jnp.float32)

    ks = jax.random.split(key, 12)
    emb = nrm(ks[0], (vocab, C)).at[0].set(0.0)               # padding_idx=0
    params = dict(
        emb=emb,
        pe=positional_encoding(max_len, C),
        # per-layer weights stacked along a leading L axis
        wqkv=nrm(ks[1], (L, C, 3 * C)), bqkv=nrm(ks[2], (L, 1, 3 * C)),
        wo=nrm(ks[3], (L, C, C)),       bo=nrm(ks[4], (L, 1, C)),
        ln1g=jnp.ones((L, 1, C), jnp.float32), ln1b=jnp.zeros((L, 1, C), jnp.float32),
        ln2g=jnp.ones((L, 1, C), jnp.float32), ln2b=jnp.zeros((L, 1, C), jnp.float32),
        w1=nrm(ks[5], (L, C, Mm)), b1=nrm(ks[6], (L, 1, Mm)),
        w2=nrm(ks[7], (L, Mm, C)), b2=nrm(ks[8], (L, 1, C)),
        lnfg=jnp.ones((1, C), jnp.float32), lnfb=jnp.zeros((1, C), jnp.float32),
        wh=nrm(ks[9], (C, vocab)), bh=nrm(ks[10], (1, vocab)),
        num_heads=num_heads,
    )
    return params


# ----------------------------- pure-JAX reference ----------------------------

def _ref_forward(idx, params):
    H = params["num_heads"]
    PREC = jax.lax.Precision.HIGHEST
    x = params["emb"][idx] + params["pe"][None, :idx.shape[1], :]
    B, T, C = x.shape
    hd = C // H
    L = params["wqkv"].shape[0]
    for l in range(L):
        g = lambda name: params[name][l]
        x2 = _layer_norm(x, g("ln1g"), g("ln1b"))
        qkv = jnp.einsum("btc,cd->btd", x2, g("wqkv"), precision=PREC) + g("bqkv")
        qkv = qkv.reshape(B, T, 3, H, hd).transpose(2, 0, 3, 1, 4)
        q, k, v = qkv[0], qkv[1], qkv[2]                       # (B, H, T, hd)
        s = jnp.einsum("bhqd,bhkd->bhqk", q, k, precision=PREC) / math.sqrt(hd)
        a = jax.nn.softmax(s, axis=-1)
        o = jnp.einsum("bhqk,bhkd->bhqd", a, v, precision=PREC)
        o = o.transpose(0, 2, 1, 3).reshape(B, T, C)
        o = jnp.einsum("btc,cd->btd", o, g("wo"), precision=PREC) + g("bo")
        x = x + o
        x2 = _layer_norm(x, g("ln2g"), g("ln2b"))
        h1 = jax.nn.relu(jnp.einsum("btc,cm->btm", x2, g("w1"), precision=PREC) + g("b1"))
        x = x + jnp.einsum("btm,mc->btc", h1, g("w2"), precision=PREC) + g("b2")
    x = _layer_norm(x, params["lnfg"], params["lnfb"])
    return jnp.einsum("btc,cv->btv", x, params["wh"], precision=PREC) + params["bh"]


# ----------------------------- main -------------------------------------------

if __name__ == "__main__":
    VOCAB, EMBED, HEADS, LAYERS, MLP, MAX_LEN = 128, 128, 4, 2, 256, 64
    B, T = 2, 16

    root = jax.random.PRNGKey(0)
    k_params, k_idx = jax.random.split(root)
    params = init_params(k_params, vocab=VOCAB, embed_dim=EMBED, num_heads=HEADS,
                         num_layers=LAYERS, mlp_dim=MLP, max_len=MAX_LEN)
    idx = jax.random.randint(k_idx, (B, T), 0, VOCAB, dtype=jnp.int32)

    logits = jax.block_until_ready(forward(idx, params))
    ref = jax.block_until_ready(_ref_forward(idx, params))

    assert logits.shape == (B, T, VOCAB)
    np.testing.assert_allclose(np.asarray(logits), np.asarray(ref), rtol=2e-2, atol=2e-2)

    print("KERNEL_OK")
</pallas_src>

<mosaic_0001>
module attributes {stable_mosaic.version = 11 : i64} {
  func.func @_fused_kernel(%arg0: i32, %arg1: memref<32x128xf32, #tpu.memory_space<vmem>>, %arg2: memref<1x128x384xbf16, #tpu.memory_space<vmem>>, %arg3: memref<1x1x384xf32, #tpu.memory_space<vmem>>, %arg4: memref<1x128x128xbf16, #tpu.memory_space<vmem>>, %arg5: memref<1x1x128xf32, #tpu.memory_space<vmem>>, %arg6: memref<1x1x128xf32, #tpu.memory_space<vmem>>, %arg7: memref<1x1x128xf32, #tpu.memory_space<vmem>>, %arg8: memref<1x1x128xf32, #tpu.memory_space<vmem>>, %arg9: memref<1x1x128xf32, #tpu.memory_space<vmem>>, %arg10: memref<1x128x256xbf16, #tpu.memory_space<vmem>>, %arg11: memref<1x1x256xf32, #tpu.memory_space<vmem>>, %arg12: memref<1x256x128xbf16, #tpu.memory_space<vmem>>, %arg13: memref<1x1x128xf32, #tpu.memory_space<vmem>>, %arg14: memref<1x128xf32, #tpu.memory_space<vmem>>, %arg15: memref<1x128xf32, #tpu.memory_space<vmem>>, %arg16: memref<128x128xbf16, #tpu.memory_space<vmem>>, %arg17: memref<1x128xf32, #tpu.memory_space<vmem>>, %arg18: memref<32x128xf32, #tpu.memory_space<vmem>>, %arg19: memref<32x128xf32, #tpu.memory_space<vmem>>) attributes {dimension_semantics = [#tpu.dimension_semantics<arbitrary>], iteration_bounds = array<i64: 2>, scalar_prefetch = 0 : i64, scratch_operands = 1 : i64, tpu.core_type = #tpu.core_type<tc>, window_params = [{pipeline_mode = #tpu.pipeline_mode<synchronous>, transform_indices = @transform_0, window_bounds = array<i64: 32, 128>}, {transform_indices = @transform_1, window_bounds = array<i64: 1, 128, 384>}, {transform_indices = @transform_2, window_bounds = array<i64: 1, 1, 384>}, {transform_indices = @transform_3, window_bounds = array<i64: 1, 128, 128>}, {transform_indices = @transform_4, window_bounds = array<i64: 1, 1, 128>}, {transform_indices = @transform_5, window_bounds = array<i64: 1, 1, 128>}, {transform_indices = @transform_6, window_bounds = array<i64: 1, 1, 128>}, {transform_indices = @transform_7, window_bounds = array<i64: 1, 1, 128>}, {transform_indices = @transform_8, window_bounds = array<i64: 1, 1, 128>}, {transform_indices = @transform_9, window_bounds = array<i64: 1, 128, 256>}, {transform_indices = @transform_10, window_bounds = array<i64: 1, 1, 256>}, {transform_indices = @transform_11, window_bounds = array<i64: 1, 256, 128>}, {transform_indices = @transform_12, window_bounds = array<i64: 1, 1, 128>}, {pipeline_mode = #tpu.pipeline_mode<synchronous>, transform_indices = @transform_13, window_bounds = array<i64: 1, 128>}, {pipeline_mode = #tpu.pipeline_mode<synchronous>, transform_indices = @transform_14, window_bounds = array<i64: 1, 128>}, {pipeline_mode = #tpu.pipeline_mode<synchronous>, transform_indices = @transform_15, window_bounds = array<i64: 128, 128>}, {pipeline_mode = #tpu.pipeline_mode<synchronous>, transform_indices = @transform_16, window_bounds = array<i64: 1, 128>}, {pipeline_mode = #tpu.pipeline_mode<synchronous>, transform_indices = @transform_17, window_bounds = array<i64: 32, 128>}]} {
    %c0_i32 = arith.constant 0 : i32
    %0 = arith.cmpi eq, %arg0, %c0_i32 : i32
    %1 = arith.extui %0 : i1 to i32
    %c0_i32_0 = arith.constant 0 : i32
    %2 = arith.cmpi ne, %1, %c0_i32_0 : i32
    scf.if %2 {
      %c0_79 = arith.constant 0 : index
      %c0_80 = arith.constant 0 : index
      %196 = vector.load %arg1[%c0_79, %c0_80] : memref<32x128xf32, #tpu.memory_space<vmem>>, vector<32x128xf32>
      %c0_81 = arith.constant 0 : index
      %c0_82 = arith.constant 0 : index
      %197 = vector.load %arg19[%c0_81, %c0_82] : memref<32x128xf32, #tpu.memory_space<vmem>>, vector<32x128xf32>
      tpu.vector_store %arg19[%c0_81, %c0_82], %196 {strides = array<i32>} : memref<32x128xf32, #tpu.memory_space<vmem>>, vector<32x128xf32>,
    } else {
    }
    %c0 = arith.constant 0 : index
    %c0_1 = arith.constant 0 : index
    %3 = vector.load %arg19[%c0, %c0_1] : memref<32x128xf32, #tpu.memory_space<vmem>>, vector<32x128xf32>
    %c0_2 = arith.constant 0 : index
    %c0_3 = arith.constant 0 : index
    %c0_4 = arith.constant 0 : index
    %4 = vector.load %arg6[%c0_2, %c0_3, %c0_4] : memref<1x1x128xf32, #tpu.memory_space<vmem>>, vector<1x1x128xf32>
    %5 = vector.shape_cast %4 : vector<1x1x128xf32> to vector<1x128xf32>
    %c0_5 = arith.constant 0 : index
    %c0_6 = arith.constant 0 : index
    %c0_7 = arith.constant 0 : index
    %6 = vector.load %arg7[%c0_5, %c0_6, %c0_7] : memref<1x1x128xf32, #tpu.memory_space<vmem>>, vector<1x1x128xf32>
    %7 = vector.shape_cast %6 : vector<1x1x128xf32> to vector<1x128xf32>
    %cst = arith.constant dense<0.000000e+00> : vector<32xf32>
    %8 = vector.multi_reduction <add>, %3, %cst [1] : vector<32x128xf32> to vector<32xf32>
    %9 = vector.shape_cast %8 : vector<32xf32> to vector<32x1xf32>
    %cst_8 = arith.constant 1.280000e+02 : f32
    %10 = vector.broadcast %cst_8 : f32 to vector<32x1xf32>
    %11 = arith.divf %9, %10 : vector<32x1xf32>
    %12 = vector.broadcast %11 : vector<32x1xf32> to vector<32x128xf32>
    %13 = arith.subf %3, %12 : vector<32x128xf32>
    %14 = arith.mulf %13, %13 : vector<32x128xf32>
    %cst_9 = arith.constant dense<0.000000e+00> : vector<32xf32>
    %15 = vector.multi_reduction <add>, %14, %cst_9 [1] : vector<32x128xf32> to vector<32xf32>
    %16 = vector.shape_cast %15 : vector<32xf32> to vector<32x1xf32>
    %cst_10 = arith.constant 1.280000e+02 : f32
    %17 = vector.broadcast %cst_10 : f32 to vector<32x1xf32>
    %18 = arith.divf %16, %17 : vector<32x1xf32>
    %19 = vector.broadcast %11 : vector<32x1xf32> to vector<32x128xf32>
    %20 = arith.subf %3, %19 : vector<32x128xf32>
    %cst_11 = arith.constant 9.99999974E-6 : f32
    %21 = vector.broadcast %cst_11 : f32 to vector<32x1xf32>
    %22 = arith.addf %18, %21 : vector<32x1xf32>
    %23 = math.rsqrt %22 : vector<32x1xf32>
    %24 = vector.broadcast %23 : vector<32x1xf32> to vector<32x128xf32>
    %25 = arith.mulf %20, %24 : vector<32x128xf32>
    %26 = vector.broadcast %5 : vector<1x128xf32> to vector<32x128xf32>
    %27 = arith.mulf %25, %26 : vector<32x128xf32>
    %28 = vector.broadcast %7 : vector<1x128xf32> to vector<32x128xf32>
    %29 = arith.addf %27, %28 : vector<32x128xf32>
    %30 = arith.truncf %29 : vector<32x128xf32> to vector<32x128xbf16>
    %c0_12 = arith.constant 0 : index
    %c0_13 = arith.constant 0 : index
    %c0_14 = arith.constant 0 : index
    %31 = vector.load %arg2[%c0_12, %c0_13, %c0_14] : memref<1x128x384xbf16, #tpu.memory_space<vmem>>, vector<1x128x384xbf16>
    %32 = vector.shape_cast %31 : vector<1x128x384xbf16> to vector<128x384xbf16>
    %cst_15 = arith.constant dense<0.000000e+00> : vector<32x384xf32>
    %33 = tpu.matmul %30, %32, %cst_15 {dimension_numbers = #tpu.dot_dimension_numbers<[1], [0], [0], [1], [0, 0, 1, 1], [], []>} : vector<32x128xbf16>, vector<128x384xbf16>, vector<32x384xf32> -> vector<32x384xf32>
    %c0_16 = arith.constant 0 : index
    %c0_17 = arith.constant 0 : index
    %c0_18 = arith.constant 0 : index
    %34 = vector.load %arg3[%c0_16, %c0_17, %c0_18] : memref<1x1x384xf32, #tpu.memory_space<vmem>>, vector<1x1x384xf32>
    %35 = vector.shape_cast %34 : vector<1x1x384xf32> to vector<1x384xf32>
    %36 = vector.broadcast %35 : vector<1x384xf32> to vector<32x384xf32>
    %37 = arith.addf %33, %36 : vector<32x384xf32>
    %38 = vector.extract_strided_slice %37 {offsets = [0, 0], sizes = [32, 128], strides = [1, 1]} : vector<32x384xf32> to vector<32x128xf32>
    %39 = vector.shape_cast %38 : vector<32x128xf32> to vector<2x16x128xf32>
    %40 = arith.truncf %39 : vector<2x16x128xf32> to vector<2x16x128xbf16>
    %41 = vector.extract_strided_slice %37 {offsets = [0, 128], sizes = [32, 128], strides = [1, 1]} : vector<32x384xf32> to vector<32x128xf32>
    %42 = vector.shape_cast %41 : vector<32x128xf32> to vector<2x16x128xf32>
    %43 = arith.truncf %42 : vector<2x16x128xf32> to vector<2x16x128xbf16>
    %44 = vector.extract_strided_slice %37 {offsets = [0, 256], sizes = [32, 128], strides = [1, 1]} : vector<32x384xf32> to vector<32x128xf32>
    %45 = vector.shape_cast %44 : vector<32x128xf32> to vector<2x16x128xf32>
    %46 = arith.truncf %45 : vector<2x16x128xf32> to vector<2x16x128xbf16>
    %c0_19 = arith.constant 0 : index
    %c0_20 = arith.constant 0 : index
    %c0_21 = arith.constant 0 : index
    %47 = vector.load %arg4[%c0_19, %c0_20, %c0_21] : memref<1x128x128xbf16, #tpu.memory_space<vmem>>, vector<1x128x128xbf16>
    %48 = vector.shape_cast %47 : vector<1x128x128xbf16> to vector<128x128xbf16>
    %cst_22 = arith.constant 0.000000e+00 : f32
    %49 = vector.broadcast %cst_22 : f32 to vector<32x128xf32>
    %50 = vector.extract_strided_slice %40 {offsets = [0, 0, 0], sizes = [2, 16, 32], strides = [1, 1, 1]} : vector<2x16x128xbf16> to vector<2x16x32xbf16>
    %51 = vector.extract_strided_slice %43 {offsets = [0, 0, 0], sizes = [2, 16, 32], strides = [1, 1, 1]} : vector<2x16x128xbf16> to vector<2x16x32xbf16>
    "tpu.trace_start"() <{level = 10 : i32, message = "bqd,bkd->bqk"}> : () -> ()
    %cst_23 = arith.constant dense<0.000000e+00> : vector<2x16x16xf32>
    %52 = tpu.matmul %50, %51, %cst_23 {dimension_numbers = #tpu.dot_dimension_numbers<[2], [2], [1], [1], [0, 0, 0, 1, 1, 1], [0], [0]>} : vector<2x16x32xbf16>, vector<2x16x32xbf16>, vector<2x16x16xf32> -> vector<2x16x16xf32>
    "tpu.trace_stop"() : () -> ()
    %cst_24 = arith.constant 0.176776692 : f32
    %53 = vector.broadcast %cst_24 : f32 to vector<2x16x16xf32>
    %54 = arith.mulf %52, %53 : vector<2x16x16xf32>
    %cst_25 = arith.constant dense<0xFF800000> : vector<2x16xf32>
    %55 = vector.multi_reduction <maximumf>, %54, %cst_25 [2] : vector<2x16x16xf32> to vector<2x16xf32>
    %56 = vector.shape_cast %55 : vector<2x16xf32> to vector<2x16x1xf32>
    %57 = vector.broadcast %56 : vector<2x16x1xf32> to vector<2x16x16xf32>
    %58 = arith.subf %54, %57 : vector<2x16x16xf32>
    %59 = math.exp %58 : vector<2x16x16xf32>
    %cst_26 = arith.constant dense<0.000000e+00> : vector<2x16xf32>
    %60 = vector.multi_reduction <add>, %59, %cst_26 [2] : vector<2x16x16xf32> to vector<2x16xf32>
    %61 = vector.shape_cast %60 : vector<2x16xf32> to vector<2x16x1xf32>
    %62 = tpu.reciprocal %61 {approx = true} : vector<2x16x1xf32> -> vector<2x16x1xf32>
    %63 = vector.broadcast %62 : vector<2x16x1xf32> to vector<2x16x16xf32>
    %64 = arith.mulf %59, %63 : vector<2x16x16xf32>
    %65 = arith.truncf %64 : vector<2x16x16xf32> to vector<2x16x16xbf16>
    %66 = vector.extract_strided_slice %46 {offsets = [0, 0, 0], sizes = [2, 16, 32], strides = [1, 1, 1]} : vector<2x16x128xbf16> to vector<2x16x32xbf16>
    "tpu.trace_start"() <{level = 10 : i32, message = "bqk,bkd->bqd"}> : () -> ()
    %cst_27 = arith.constant dense<0.000000e+00> : vector<2x16x32xf32>
    %67 = tpu.matmul %65, %66, %cst_27 {dimension_numbers = #tpu.dot_dimension_numbers<[2], [1], [1], [2], [0, 0, 0, 1, 1, 2], [0], [0]>} : vector<2x16x16xbf16>, vector<2x16x32xbf16>, vector<2x16x32xf32> -> vector<2x16x32xf32>
    "tpu.trace_stop"() : () -> ()
    %68 = vector.shape_cast %67 : vector<2x16x32xf32> to vector<32x32xf32>
    %69 = arith.truncf %68 : vector<32x32xf32> to vector<32x32xbf16>
    %70 = vector.extract_strided_slice %48 {offsets = [0, 0], sizes = [32, 128], strides = [1, 1]} : vector<128x128xbf16> to vector<32x128xbf16>
    %cst_28 = arith.constant dense<0.000000e+00> : vector<32x128xf32>
    %71 = tpu.matmul %69, %70, %cst_28 {dimension_numbers = #tpu.dot_dimension_numbers<[1], [0], [0], [1], [0, 0, 1, 1], [], []>} : vector<32x32xbf16>, vector<32x128xbf16>, vector<32x128xf32> -> vector<32x128xf32>
    %72 = arith.addf %49, %71 : vector<32x128xf32>
    %73 = vector.extract_strided_slice %40 {offsets = [0, 0, 32], sizes = [2, 16, 32], strides = [1, 1, 1]} : vector<2x16x128xbf16> to vector<2x16x32xbf16>
    %74 = vector.extract_strided_slice %43 {offsets = [0, 0, 32], sizes = [2, 16, 32], strides = [1, 1, 1]} : vector<2x16x128xbf16> to vector<2x16x32xbf16>
    "tpu.trace_start"() <{level = 10 : i32, message = "bqd,bkd->bqk"}> : () -> ()
    %cst_29 = arith.constant dense<0.000000e+00> : vector<2x16x16xf32>
    %75 = tpu.matmul %73, %74, %cst_29 {dimension_numbers = #tpu.dot_dimension_numbers<[2], [2], [1], [1], [0, 0, 0, 1, 1, 1], [0], [0]>} : vector<2x16x32xbf16>, vector<2x16x32xbf16>, vector<2x16x16xf32> -> vector<2x16x16xf32>
    "tpu.trace_stop"() : () -> ()
    %cst_30 = arith.constant 0.176776692 : f32
    %76 = vector.broadcast %cst_30 : f32 to vector<2x16x16xf32>
    %77 = arith.mulf %75, %76 : vector<2x16x16xf32>
    %cst_31 = arith.constant dense<0xFF800000> : vector<2x16xf32>
    %78 = vector.multi_reduction <maximumf>, %77, %cst_31 [2] : vector<2x16x16xf32> to vector<2x16xf32>
    %79 = vector.shape_cast %78 : vector<2x16xf32> to vector<2x16x1xf32>
    %80 = vector.broadcast %79 : vector<2x16x1xf32> to vector<2x16x16xf32>
    %81 = arith.subf %77, %80 : vector<2x16x16xf32>
    %82 = math.exp %81 : vector<2x16x16xf32>
    %cst_32 = arith.constant dense<0.000000e+00> : vector<2x16xf32>
    %83 = vector.multi_reduction <add>, %82, %cst_32 [2] : vector<2x16x16xf32> to vector<2x16xf32>
    %84 = vector.shape_cast %83 : vector<2x16xf32> to vector<2x16x1xf32>
    %85 = tpu.reciprocal %84 {approx = true} : vector<2x16x1xf32> -> vector<2x16x1xf32>
    %86 = vector.broadcast %85 : vector<2x16x1xf32> to vector<2x16x16xf32>
    %87 = arith.mulf %82, %86 : vector<2x16x16xf32>
    %88 = arith.truncf %87 : vector<2x16x16xf32> to vector<2x16x16xbf16>
    %89 = vector.extract_strided_slice %46 {offsets = [0, 0, 32], sizes = [2, 16, 32], strides = [1, 1, 1]} : vector<2x16x128xbf16> to vector<2x16x32xbf16>
    "tpu.trace_start"() <{level = 10 : i32, message = "bqk,bkd->bqd"}> : () -> ()
    %cst_33 = arith.constant dense<0.000000e+00> : vector<2x16x32xf32>
    %90 = tpu.matmul %88, %89, %cst_33 {dimension_numbers = #tpu.dot_dimension_numbers<[2], [1], [1], [2], [0, 0, 0, 1, 1, 2], [0], [0]>} : vector<2x16x16xbf16>, vector<2x16x32xbf16>, vector<2x16x32xf32> -> vector<2x16x32xf32>
    "tpu.trace_stop"() : () -> ()
    %91 = vector.shape_cast %90 : vector<2x16x32xf32> to vector<32x32xf32>
    %92 = arith.truncf %91 : vector<32x32xf32> to vector<32x32xbf16>
    %93 = vector.extract_strided_slice %48 {offsets = [32, 0], sizes = [32, 128], strides = [1, 1]} : vector<128x128xbf16> to vector<32x128xbf16>
    %cst_34 = arith.constant dense<0.000000e+00> : vector<32x128xf32>
    %94 = tpu.matmul %92, %93, %cst_34 {dimension_numbers = #tpu.dot_dimension_numbers<[1], [0], [0], [1], [0, 0, 1, 1], [], []>} : vector<32x32xbf16>, vector<32x128xbf16>, vector<32x128xf32> -> vector<32x128xf32>
    %95 = arith.addf %72, %94 : vector<32x128xf32>
    %96 = vector.extract_strided_slice %40 {offsets = [0, 0, 64], sizes = [2, 16, 32], strides = [1, 1, 1]} : vector<2x16x128xbf16> to vector<2x16x32xbf16>
    %97 = vector.extract_strided_slice %43 {offsets = [0, 0, 64], sizes = [2, 16, 32], strides = [1, 1, 1]} : vector<2x16x128xbf16> to vector<2x16x32xbf16>
    "tpu.trace_start"() <{level = 10 : i32, message = "bqd,bkd->bqk"}> : () -> ()
    %cst_35 = arith.constant dense<0.000000e+00> : vector<2x16x16xf32>
    %98 = tpu.matmul %96, %97, %cst_35 {dimension_numbers = #tpu.dot_dimension_numbers<[2], [2], [1], [1], [0, 0, 0, 1, 1, 1], [0], [0]>} : vector<2x16x32xbf16>, vector<2x16x32xbf16>, vector<2x16x16xf32> -> vector<2x16x16xf32>
    "tpu.trace_stop"() : () -> ()
    %cst_36 = arith.constant 0.176776692 : f32
    %99 = vector.broadcast %cst_36 : f32 to vector<2x16x16xf32>
    %100 = arith.mulf %98, %99 : vector<2x16x16xf32>
    %cst_37 = arith.constant dense<0xFF800000> : vector<2x16xf32>
    %101 = vector.multi_reduction <maximumf>, %100, %cst_37 [2] : vector<2x16x16xf32> to vector<2x16xf32>
    %102 = vector.shape_cast %101 : vector<2x16xf32> to vector<2x16x1xf32>
    %103 = vector.broadcast %102 : vector<2x16x1xf32> to vector<2x16x16xf32>
    %104 = arith.subf %100, %103 : vector<2x16x16xf32>
    %105 = math.exp %104 : vector<2x16x16xf32>
    %cst_38 = arith.constant dense<0.000000e+00> : vector<2x16xf32>
    %106 = vector.multi_reduction <add>, %105, %cst_38 [2] : vector<2x16x16xf32> to vector<2x16xf32>
    %107 = vector.shape_cast %106 : vector<2x16xf32> to vector<2x16x1xf32>
    %108 = tpu.reciprocal %107 {approx = true} : vector<2x16x1xf32> -> vector<2x16x1xf32>
    %109 = vector.broadcast %108 : vector<2x16x1xf32> to vector<2x16x16xf32>
    %110 = arith.mulf %105, %109 : vector<2x16x16xf32>
    %111 = arith.truncf %110 : vector<2x16x16xf32> to vector<2x16x16xbf16>
    %112 = vector.extract_strided_slice %46 {offsets = [0, 0, 64], sizes = [2, 16, 32], strides = [1, 1, 1]} : vector<2x16x128xbf16> to vector<2x16x32xbf16>
    "tpu.trace_start"() <{level = 10 : i32, message = "bqk,bkd->bqd"}> : () -> ()
    %cst_39 = arith.constant dense<0.000000e+00> : vector<2x16x32xf32>
    %113 = tpu.matmul %111, %112, %cst_39 {dimension_numbers = #tpu.dot_dimension_numbers<[2], [1], [1], [2], [0, 0, 0, 1, 1, 2], [0], [0]>} : vector<2x16x16xbf16>, vector<2x16x32xbf16>, vector<2x16x32xf32> -> vector<2x16x32xf32>
    "tpu.trace_stop"() : () -> ()
    %114 = vector.shape_cast %113 : vector<2x16x32xf32> to vector<32x32xf32>
    %115 = arith.truncf %114 : vector<32x32xf32> to vector<32x32xbf16>
    %116 = vector.extract_strided_slice %48 {offsets = [64, 0], sizes = [32, 128], strides = [1, 1]} : vector<128x128xbf16> to vector<32x128xbf16>
    %cst_40 = arith.constant dense<0.000000e+00> : vector<32x128xf32>
    %117 = tpu.matmul %115, %116, %cst_40 {dimension_numbers = #tpu.dot_dimension_numbers<[1], [0], [0], [1], [0, 0, 1, 1], [], []>} : vector<32x32xbf16>, vector<32x128xbf16>, vector<32x128xf32> -> vector<32x128xf32>
    %118 = arith.addf %95, %117 : vector<32x128xf32>
    %119 = vector.extract_strided_slice %40 {offsets = [0, 0, 96], sizes = [2, 16, 32], strides = [1, 1, 1]} : vector<2x16x128xbf16> to vector<2x16x32xbf16>
    %120 = vector.extract_strided_slice %43 {offsets = [0, 0, 96], sizes = [2, 16, 32], strides = [1, 1, 1]} : vector<2x16x128xbf16> to vector<2x16x32xbf16>
    "tpu.trace_start"() <{level = 10 : i32, message = "bqd,bkd->bqk"}> : () -> ()
    %cst_41 = arith.constant dense<0.000000e+00> : vector<2x16x16xf32>
    %121 = tpu.matmul %119, %120, %cst_41 {dimension_numbers = #tpu.dot_dimension_numbers<[2], [2], [1], [1], [0, 0, 0, 1, 1, 1], [0], [0]>} : vector<2x16x32xbf16>, vector<2x16x32xbf16>, vector<2x16x16xf32> -> vector<2x16x16xf32>
    "tpu.trace_stop"() : () -> ()
    %cst_42 = arith.constant 0.176776692 : f32
    %122 = vector.broadcast %cst_42 : f32 to vector<2x16x16xf32>
    %123 = arith.mulf %121, %122 : vector<2x16x16xf32>
    %cst_43 = arith.constant dense<0xFF800000> : vector<2x16xf32>
    %124 = vector.multi_reduction <maximumf>, %123, %cst_43 [2] : vector<2x16x16xf32> to vector<2x16xf32>
    %125 = vector.shape_cast %124 : vector<2x16xf32> to vector<2x16x1xf32>
    %126 = vector.broadcast %125 : vector<2x16x1xf32> to vector<2x16x16xf32>
    %127 = arith.subf %123, %126 : vector<2x16x16xf32>
    %128 = math.exp %127 : vector<2x16x16xf32>
    %cst_44 = arith.constant dense<0.000000e+00> : vector<2x16xf32>
    %129 = vector.multi_reduction <add>, %128, %cst_44 [2] : vector<2x16x16xf32> to vector<2x16xf32>
    %130 = vector.shape_cast %129 : vector<2x16xf32> to vector<2x16x1xf32>
    %131 = tpu.reciprocal %130 {approx = true} : vector<2x16x1xf32> -> vector<2x16x1xf32>
    %132 = vector.broadcast %131 : vector<2x16x1xf32> to vector<2x16x16xf32>
    %133 = arith.mulf %128, %132 : vector<2x16x16xf32>
    %134 = arith.truncf %133 : vector<2x16x16xf32> to vector<2x16x16xbf16>
    %135 = vector.extract_strided_slice %46 {offsets = [0, 0, 96], sizes = [2, 16, 32], strides = [1, 1, 1]} : vector<2x16x128xbf16> to vector<2x16x32xbf16>
    "tpu.trace_start"() <{level = 10 : i32, message = "bqk,bkd->bqd"}> : () -> ()
    %cst_45 = arith.constant dense<0.000000e+00> : vector<2x16x32xf32>
    %136 = tpu.matmul %134, %135, %cst_45 {dimension_numbers = #tpu.dot_dimension_numbers<[2], [1], [1], [2], [0, 0, 0, 1, 1, 2], [0], [0]>} : vector<2x16x16xbf16>, vector<2x16x32xbf16>, vector<2x16x32xf32> -> vector<2x16x32xf32>
    "tpu.trace_stop"() : () -> ()
    %137 = vector.shape_cast %136 : vector<2x16x32xf32> to vector<32x32xf32>
    %138 = arith.truncf %137 : vector<32x32xf32> to vector<32x32xbf16>
    %139 = vector.extract_strided_slice %48 {offsets = [96, 0], sizes = [32, 128], strides = [1, 1]} : vector<128x128xbf16> to vector<32x128xbf16>
    %cst_46 = arith.constant dense<0.000000e+00> : vector<32x128xf32>
    %140 = tpu.matmul %138, %139, %cst_46 {dimension_numbers = #tpu.dot_dimension_numbers<[1], [0], [0], [1], [0, 0, 1, 1], [], []>} : vector<32x32xbf16>, vector<32x128xbf16>, vector<32x128xf32> -> vector<32x128xf32>
    %141 = arith.addf %118, %140 : vector<32x128xf32>
    %142 = arith.addf %3, %141 : vector<32x128xf32>
    %c0_47 = arith.constant 0 : index
    %c0_48 = arith.constant 0 : index
    %c0_49 = arith.constant 0 : index
    %143 = vector.load %arg5[%c0_47, %c0_48, %c0_49] : memref<1x1x128xf32, #tpu.memory_space<vmem>>, vector<1x1x128xf32>
    %144 = vector.shape_cast %143 : vector<1x1x128xf32> to vector<1x128xf32>
    %145 = vector.broadcast %144 : vector<1x128xf32> to vector<32x128xf32>
    %146 = arith.addf %142, %145 : vector<32x128xf32>
    %c0_50 = arith.constant 0 : index
    %c0_51 = arith.constant 0 : index
    %c0_52 = arith.constant 0 : index
    %147 = vector.load %arg8[%c0_50, %c0_51, %c0_52] : memref<1x1x128xf32, #tpu.memory_space<vmem>>, vector<1x1x128xf32>
    %148 = vector.shape_cast %147 : vector<1x1x128xf32> to vector<1x128xf32>
    %c0_53 = arith.constant 0 : index
    %c0_54 = arith.constant 0 : index
    %c0_55 = arith.constant 0 : index
    %149 = vector.load %arg9[%c0_53, %c0_54, %c0_55] : memref<1x1x128xf32, #tpu.memory_space<vmem>>, vector<1x1x128xf32>
    %150 = vector.shape_cast %149 : vector<1x1x128xf32> to vector<1x128xf32>
    %cst_56 = arith.constant dense<0.000000e+00> : vector<32xf32>
    %151 = vector.multi_reduction <add>, %146, %cst_56 [1] : vector<32x128xf32> to vector<32xf32>
    %152 = vector.shape_cast %151 : vector<32xf32> to vector<32x1xf32>
    %cst_57 = arith.constant 1.280000e+02 : f32
    %153 = vector.broadcast %cst_57 : f32 to vector<32x1xf32>
    %154 = arith.divf %152, %153 : vector<32x1xf32>
    %155 = vector.broadcast %154 : vector<32x1xf32> to vector<32x128xf32>
    %156 = arith.subf %146, %155 : vector<32x128xf32>
    %157 = arith.mulf %156, %156 : vector<32x128xf32>
    %cst_58 = arith.constant dense<0.000000e+00> : vector<32xf32>
    %158 = vector.multi_reduction <add>, %157, %cst_58 [1] : vector<32x128xf32> to vector<32xf32>
    %159 = vector.shape_cast %158 : vector<32xf32> to vector<32x1xf32>
    %cst_59 = arith.constant 1.280000e+02 : f32
    %160 = vector.broadcast %cst_59 : f32 to vector<32x1xf32>
    %161 = arith.divf %159, %160 : vector<32x1xf32>
    %162 = vector.broadcast %154 : vector<32x1xf32> to vector<32x128xf32>
    %163 = arith.subf %146, %162 : vector<32x128xf32>
    %cst_60 = arith.constant 9.99999974E-6 : f32
    %164 = vector.broadcast %cst_60 : f32 to vector<32x1xf32>
    %165 = arith.addf %161, %164 : vector<32x1xf32>
    %166 = math.rsqrt %165 : vector<32x1xf32>
    %167 = vector.broadcast %166 : vector<32x1xf32> to vector<32x128xf32>
    %168 = arith.mulf %163, %167 : vector<32x128xf32>
    %169 = vector.broadcast %148 : vector<1x128xf32> to vector<32x128xf32>
    %170 = arith.mulf %168, %169 : vector<32x128xf32>
    %171 = vector.broadcast %150 : vector<1x128xf32> to vector<32x128xf32>
    %172 = arith.addf %170, %171 : vector<32x128xf32>
    %173 = arith.truncf %172 : vector<32x128xf32> to vector<32x128xbf16>
    %c0_61 = arith.constant 0 : index
    %c0_62 = arith.constant 0 : index
    %c0_63 = arith.constant 0 : index
    %174 = vector.load %arg10[%c0_61, %c0_62, %c0_63] : memref<1x128x256xbf16, #tpu.memory_space<vmem>>, vector<1x128x256xbf16>
    %175 = vector.shape_cast %174 : vector<1x128x256xbf16> to vector<128x256xbf16>
    %cst_64 = arith.constant dense<0.000000e+00> : vector<32x256xf32>
    %176 = tpu.matmul %173, %175, %cst_64 {dimension_numbers = #tpu.dot_dimension_numbers<[1], [0], [0], [1], [0, 0, 1, 1], [], []>} : vector<32x128xbf16>, vector<128x256xbf16>, vector<32x256xf32> -> vector<32x256xf32>
    %c0_65 = arith.constant 0 : index
    %c0_66 = arith.constant 0 : index
    %c0_67 = arith.constant 0 : index
    %177 = vector.load %arg11[%c0_65, %c0_66, %c0_67] : memref<1x1x256xf32, #tpu.memory_space<vmem>>, vector<1x1x256xf32>
    %178 = vector.shape_cast %177 : vector<1x1x256xf32> to vector<1x256xf32>
    %179 = vector.broadcast %178 : vector<1x256xf32> to vector<32x256xf32>
    %180 = arith.addf %176, %179 : vector<32x256xf32>
    %cst_68 = arith.constant 0.000000e+00 : f32
    %181 = vector.broadcast %cst_68 : f32 to vector<32x256xf32>
    %182 = arith.maximumf %180, %181 : vector<32x256xf32>
    %183 = arith.truncf %182 : vector<32x256xf32> to vector<32x256xbf16>
    %c0_69 = arith.constant 0 : index
    %c0_70 = arith.constant 0 : index
    %c0_71 = arith.constant 0 : index
    %184 = vector.load %arg12[%c0_69, %c0_70, %c0_71] : memref<1x256x128xbf16, #tpu.memory_space<vmem>>, vector<1x256x128xbf16>
    %185 = vector.shape_cast %184 : vector<1x256x128xbf16> to vector<256x128xbf16>
    %cst_72 = arith.constant dense<0.000000e+00> : vector<32x128xf32>
    %186 = tpu.matmul %183, %185, %cst_72 {dimension_numbers = #tpu.dot_dimension_numbers<[1], [0], [0], [1], [0, 0, 1, 1], [], []>} : vector<32x256xbf16>, vector<256x128xbf16>, vector<32x128xf32> -> vector<32x128xf32>
    %c0_73 = arith.constant 0 : index
    %c0_74 = arith.constant 0 : index
    %c0_75 = arith.constant 0 : index
    %187 = vector.load %arg13[%c0_73, %c0_74, %c0_75] : memref<1x1x128xf32, #tpu.memory_space<vmem>>, vector<1x1x128xf32>
    %188 = vector.shape_cast %187 : vector<1x1x128xf32> to vector<1x128xf32>
    %189 = vector.broadcast %188 : vector<1x128xf32> to vector<32x128xf32>
    %190 = arith.addf %186, %189 : vector<32x128xf32>
    %191 = arith.addf %146, %190 : vector<32x128xf32>
    %c0_76 = arith.constant 0 : index
    %c0_77 = arith.constant 0 : index
    %192 = vector.load %arg19[%c0_76, %c0_77] : memref<32x128xf32, #tpu.memory_space<vmem>>, vector<32x128xf32>
    tpu.vector_store %arg19[%c0_76, %c0_77], %191 {strides = array<i32>} : memref<32x128xf32, #tpu.memory_space<vmem>>, vector<32x128xf32>,
    %c1_i32 = arith.constant 1 : i32
    %193 = arith.cmpi eq, %arg0, %c1_i32 : i32
    %194 = arith.extui %193 : i1 to i32
    %c0_i32_78 = arith.constant 0 : i32
    %195 = arith.cmpi ne, %194, %c0_i32_78 : i32
    scf.if %195 {
      %c0_79 = arith.constant 0 : index
      %c0_80 = arith.constant 0 : index
      %196 = vector.load %arg14[%c0_79, %c0_80] : memref<1x128xf32, #tpu.memory_space<vmem>>, vector<1x128xf32>
      %c0_81 = arith.constant 0 : index
      %c0_82 = arith.constant 0 : index
      %197 = vector.load %arg15[%c0_81, %c0_82] : memref<1x128xf32, #tpu.memory_space<vmem>>, vector<1x128xf32>
      %cst_83 = arith.constant dense<0.000000e+00> : vector<32xf32>
      %198 = vector.multi_reduction <add>, %191, %cst_83 [1] : vector<32x128xf32> to vector<32xf32>
      %199 = vector.shape_cast %198 : vector<32xf32> to vector<32x1xf32>
      %cst_84 = arith.constant 1.280000e+02 : f32
      %200 = vector.broadcast %cst_84 : f32 to vector<32x1xf32>
      %201 = arith.divf %199, %200 : vector<32x1xf32>
      %202 = vector.broadcast %201 : vector<32x1xf32> to vector<32x128xf32>
      %203 = arith.subf %191, %202 : vector<32x128xf32>
      %204 = arith.mulf %203, %203 : vector<32x128xf32>
      %cst_85 = arith.constant dense<0.000000e+00> : vector<32xf32>
      %205 = vector.multi_reduction <add>, %204, %cst_85 [1] : vector<32x128xf32> to vector<32xf32>
      %206 = vector.shape_cast %205 : vector<32xf32> to vector<32x1xf32>
      %cst_86 = arith.constant 1.280000e+02 : f32
      %207 = vector.broadcast %cst_86 : f32 to vector<32x1xf32>
      %208 = arith.divf %206, %207 : vector<32x1xf32>
      %209 = vector.broadcast %201 : vector<32x1xf32> to vector<32x128xf32>
      %210 = arith.subf %191, %209 : vector<32x128xf32>
      %cst_87 = arith.constant 9.99999974E-6 : f32
      %211 = vector.broadcast %cst_87 : f32 to vector<32x1xf32>
      %212 = arith.addf %208, %211 : vector<32x1xf32>
      %213 = math.rsqrt %212 : vector<32x1xf32>
      %214 = vector.broadcast %213 : vector<32x1xf32> to vector<32x128xf32>
      %215 = arith.mulf %210, %214 : vector<32x128xf32>
      %216 = vector.broadcast %196 : vector<1x128xf32> to vector<32x128xf32>
      %217 = arith.mulf %215, %216 : vector<32x128xf32>
      %218 = vector.broadcast %197 : vector<1x128xf32> to vector<32x128xf32>
      %219 = arith.addf %217, %218 : vector<32x128xf32>
      %220 = arith.truncf %219 : vector<32x128xf32> to vector<32x128xbf16>
      %c0_88 = arith.constant 0 : index
      %c0_89 = arith.constant 0 : index
      %221 = vector.load %arg16[%c0_88, %c0_89] : memref<128x128xbf16, #tpu.memory_space<vmem>>, vector<128x128xbf16>
      %cst_90 = arith.constant dense<0.000000e+00> : vector<32x128xf32>
      %222 = tpu.matmul %220, %221, %cst_90 {dimension_numbers = #tpu.dot_dimension_numbers<[1], [0], [0], [1], [0, 0, 1, 1], [], []>} : vector<32x128xbf16>, vector<128x128xbf16>, vector<32x128xf32> -> vector<32x128xf32>
      %c0_91 = arith.constant 0 : index
      %c0_92 = arith.constant 0 : index
      %223 = vector.load %arg17[%c0_91, %c0_92] : memref<1x128xf32, #tpu.memory_space<vmem>>, vector<1x128xf32>
      %224 = vector.broadcast %223 : vector<1x128xf32> to vector<32x128xf32>
      %225 = arith.addf %222, %224 : vector<32x128xf32>
      %c0_93 = arith.constant 0 : index
      %c0_94 = arith.constant 0 : index
      %226 = vector.load %arg18[%c0_93, %c0_94] : memref<32x128xf32, #tpu.memory_space<vmem>>, vector<32x128xf32>
      tpu.vector_store %arg18[%c0_93, %c0_94], %225 {strides = array<i32>} : memref<32x128xf32, #tpu.memory_space<vmem>>, vector<32x128xf32>,
    } else {
    }
    return
  }
  func.func @transform_0(%arg0: i32) -> (i32, i32) {
    %c0_i32 = arith.constant 0 : i32
    %c0_i32_0 = arith.constant 0 : i32
    %c0_i32_1 = arith.constant 0 : i32
    return %c0_i32, %c0_i32_0 : i32, i32
  }
  func.func @transform_1(%arg0: i32) -> (i32, i32, i32) {
    %c0_i32 = arith.constant 0 : i32
    %c0_i32_0 = arith.constant 0 : i32
    %c0_i32_1 = arith.constant 0 : i32
    return %arg0, %c0_i32, %c0_i32_0 : i32, i32, i32
  }
  func.func @transform_2(%arg0: i32) -> (i32, i32, i32) {
    %c0_i32 = arith.constant 0 : i32
    %c0_i32_0 = arith.constant 0 : i32
    %c0_i32_1 = arith.constant 0 : i32
    return %arg0, %c0_i32, %c0_i32_0 : i32, i32, i32
  }
  func.func @transform_3(%arg0: i32) -> (i32, i32, i32) {
    %c0_i32 = arith.constant 0 : i32
    %c0_i32_0 = arith.constant 0 : i32
    %c0_i32_1 = arith.constant 0 : i32
    return %arg0, %c0_i32, %c0_i32_0 : i32, i32, i32
  }
  func.func @transform_4(%arg0: i32) -> (i32, i32, i32) {
    %c0_i32 = arith.constant 0 : i32
    %c0_i32_0 = arith.constant 0 : i32
    %c0_i32_1 = arith.constant 0 : i32
    return %arg0, %c0_i32, %c0_i32_0 : i32, i32, i32
  }
  func.func @transform_5(%arg0: i32) -> (i32, i32, i32) {
    %c0_i32 = arith.constant 0 : i32
    %c0_i32_0 = arith.constant 0 : i32
    %c0_i32_1 = arith.constant 0 : i32
    return %arg0, %c0_i32, %c0_i32_0 : i32, i32, i32
  }
  func.func @transform_6(%arg0: i32) -> (i32, i32, i32) {
    %c0_i32 = arith.constant 0 : i32
    %c0_i32_0 = arith.constant 0 : i32
    %c0_i32_1 = arith.constant 0 : i32
    return %arg0, %c0_i32, %c0_i32_0 : i32, i32, i32
  }
  func.func @transform_7(%arg0: i32) -> (i32, i32, i32) {
    %c0_i32 = arith.constant 0 : i32
    %c0_i32_0 = arith.constant 0 : i32
    %c0_i32_1 = arith.constant 0 : i32
    return %arg0, %c0_i32, %c0_i32_0 : i32, i32, i32
  }
  func.func @transform_8(%arg0: i32) -> (i32, i32, i32) {
    %c0_i32 = arith.constant 0 : i32
    %c0_i32_0 = arith.constant 0 : i32
    %c0_i32_1 = arith.constant 0 : i32
    return %arg0, %c0_i32, %c0_i32_0 : i32, i32, i32
  }
  func.func @transform_9(%arg0: i32) -> (i32, i32, i32) {
    %c0_i32 = arith.constant 0 : i32
    %c0_i32_0 = arith.constant 0 : i32
    %c0_i32_1 = arith.constant 0 : i32
    return %arg0, %c0_i32, %c0_i32_0 : i32, i32, i32
  }
  func.func @transform_10(%arg0: i32) -> (i32, i32, i32) {
    %c0_i32 = arith.constant 0 : i32
    %c0_i32_0 = arith.constant 0 : i32
    %c0_i32_1 = arith.constant 0 : i32
    return %arg0, %c0_i32, %c0_i32_0 : i32, i32, i32
  }
  func.func @transform_11(%arg0: i32) -> (i32, i32, i32) {
    %c0_i32 = arith.constant 0 : i32
    %c0_i32_0 = arith.constant 0 : i32
    %c0_i32_1 = arith.constant 0 : i32
    return %arg0, %c0_i32, %c0_i32_0 : i32, i32, i32
  }
  func.func @transform_12(%arg0: i32) -> (i32, i32, i32) {
    %c0_i32 = arith.constant 0 : i32
    %c0_i32_0 = arith.constant 0 : i32
    %c0_i32_1 = arith.constant 0 : i32
    return %arg0, %c0_i32, %c0_i32_0 : i32, i32, i32
  }
  func.func @transform_13(%arg0: i32) -> (i32, i32) {
    %c0_i32 = arith.constant 0 : i32
    %c0_i32_0 = arith.constant 0 : i32
    %c0_i32_1 = arith.constant 0 : i32
    return %c0_i32, %c0_i32_0 : i32, i32
  }
  func.func @transform_14(%arg0: i32) -> (i32, i32) {
    %c0_i32 = arith.constant 0 : i32
    %c0_i32_0 = arith.constant 0 : i32
    %c0_i32_1 = arith.constant 0 : i32
    return %c0_i32, %c0_i32_0 : i32, i32
  }
  func.func @transform_15(%arg0: i32) -> (i32, i32) {
    %c0_i32 = arith.constant 0 : i32
    %c0_i32_0 = arith.constant 0 : i32
    %c0_i32_1 = arith.constant 0 : i32
    return %c0_i32, %c0_i32_0 : i32, i32
  }
  func.func @transform_16(%arg0: i32) -> (i32, i32) {
    %c0_i32 = arith.constant 0 : i32
    %c0_i32_0 = arith.constant 0 : i32
    %c0_i32_1 = arith.constant 0 : i32
    return %c0_i32, %c0_i32_0 : i32, i32
  }
  func.func @transform_17(%arg0: i32) -> (i32, i32) {
    %c0_i32 = arith.constant 0 : i32
    %c0_i32_0 = arith.constant 0 : i32
    %c0_i32_1 = arith.constant 0 : i32
    return %c0_i32, %c0_i32_0 : i32, i32
  }
}

</mosaic_0001>

<bundles_post_ra>
// kernel: tpu_custom_call.1
= control target key start
LH: loop header
LB: loop body
LE: loop exit
PB: predicated region body
PF: predicated region fallthrough
CT: control target
= control target key end

     0   :  { %s5154_s0 = inlined_call_operand.hbm [shape: f32[32,128], index: 0, kind: input, shape index: {}]   ;;  %s5155_s1 = inlined_call_operand.hbm [shape: bf16[2,128,384], index: 1, kind: input, shape index: {}]   ;;  %s5156_s2 = inlined_call_operand.vmem [shape: f32[2,1,384], index: 2, kind: input, shape index: {}]   ;;  %s5157_s3 = inlined_call_operand.hbm [shape: bf16[2,128,128], index: 3, kind: input, shape index: {}]   ;;  %s5158_s4 = inlined_call_operand.vmem [shape: f32[2,1,128], index: 4, kind: input, shape index: {}]   ;;  %s5159_s5 = inlined_call_operand.vmem [shape: f32[2,1,128], index: 5, kind: input, shape index: {}]   ;;  %s5160_s6 = inlined_call_operand.vmem [shape: f32[2,1,128], index: 6, kind: input, shape index: {}]   ;;  %s5161_s7 = inlined_call_operand.vmem [shape: f32[2,1,128], index: 7, kind: input, shape index: {}]   ;;  %s5162_s8 = inlined_call_operand.vmem [shape: f32[2,1,128], index: 8, kind: input, shape index: {}]   ;;  %s5163_s9 = inlined_call_operand.hbm [shape: bf16[2,128,256], index: 9, kind: input, shape index: {}]   ;;  %s5164_s10 = inlined_call_operand.vmem [shape: f32[2,1,256], index: 10, kind: input, shape index: {}]   ;;  %s5165_s11 = inlined_call_operand.hbm [shape: bf16[2,256,128], index: 11, kind: input, shape index: {}]   ;;  %s5166_s12 = inlined_call_operand.vmem [shape: f32[2,1,128], index: 12, kind: input, shape index: {}]   ;;  %s5167_s13 = inlined_call_operand.vmem [shape: f32[1,128], index: 13, kind: input, shape index: {}]   ;;  %s5168_s14 = inlined_call_operand.vmem [shape: f32[1,128], index: 14, kind: input, shape index: {}]   ;;  %s5169_s15 = inlined_call_operand.hbm [shape: bf16[128,128], index: 15, kind: input, shape index: {}]   ;;  %s5170_s16 = inlined_call_operand.vmem [shape: f32[1,128], index: 16, kind: input, shape index: {}]   ;;  %s5171_s17 = inlined_call_operand.hbm [shape: f32[32,128], index: 17, kind: output, shape index: {}]  }
   0x1   :  { %5189 = sst [smem:[#allocation23_spill]] %s5154_s0 }
   0x2   :  { %5190 = sst [smem:[#allocation24_spill]] %s5155_s1 }
   0x3   :  { %5191 = sst [smem:[#allocation25_spill]] %s5156_s2 }
   0x4   :  { %5192 = sst [smem:[#allocation26_spill]] %s5157_s3 }
   0x5   :  { %5193 = sst [smem:[#allocation27_spill]] %s5159_s5 }
   0x6   :  { %5194 = sst [smem:[#allocation28_spill]] %s5160_s6 }
   0x7   :  { %5195 = sst [smem:[#allocation29_spill]] %s5161_s7 }
   0x8   :  { %5196 = sst [smem:[#allocation30_spill]] %s5162_s8 }
   0x9   :  { %5197 = sst [smem:[#allocation31_spill]] %s5163_s9 }
   0xa   :  { %5198 = sst [smem:[#allocation32_spill]] %s5164_s10 }
   0xb   :  { %5199 = sst [smem:[#allocation33_spill]] %s5165_s11 }
   0xc   :  { %5200 = sst [smem:[#allocation34_spill]] %s5166_s12 }
   0xd   :  { %5201 = sst [smem:[#allocation35_spill]] %s5167_s13 }
   0xe   :  { %5202 = sst [smem:[#allocation36_spill]] %s5168_s14 }
   0xf   :  { %5203 = sst [smem:[#allocation37_spill]] %s5170_s16 }
  0x10   :  { %5204 = sst [smem:[#allocation38_spill]] %s5171_s17 }
  0x11   :  { %22 = vsyncpa [#allocation4], 0 }
  0x12   :  { %23 = vsyncpa [#allocation7], 0 }
  0x13   :  { %25 = vsyncpa [#allocation7 + $0x1], 0 }
  0x14   :  { %26 = vsyncpa [#allocation10], 0 }
  0x15   :  { %28 = vsyncpa [#allocation10 + $0x1], 0 }
  0x16   :  { %29 = vsyncpa [#allocation13], 0 }
  0x17   :  { %30 = vsyncpa [#allocation5], 0  ;;  %s4389_s24 = smov 0   ;;  %s4391_s25 = smov 0  }
  0x18   :  { %s4393_s26 = smov 0   ;;  %s4395_s27 = smov 0  }
  0x19 LB: > { %5205 = sst [smem:[#allocation20_spill]] %s4272_s26  ;;  %s4410_s28 = sadd.s32 1, %s4276_s27   ;;  %s4276_s27 = sphi %s4395_s27, %s5250_s27   ;;  %s4272_s26 = sphi %s4393_s26, %s5252_s26   ;;  %s4268_s25 = sphi %s4391_s25, %s5254_s25   ;;  %s4264_s24 = sphi %s4389_s24, %s5253_s24  }
  0x1a   : > { %5206 = sst [smem:[#allocation21_spill]] %s4410_s28  ;;  %s64_s29 = sadd.s32 1, %s4272_s26 }
  0x1b   : > { %s61_s0 = ssub.s32 %s4276_s27, %s4410_s28  ;;  %p71_p0 = scmp.ne.s32.totalorder %s4272_s26, %s4268_s25 }
  0x1c   : > { %p62_p1 = scmp.eq.s32.totalorder %s61_s0, 0  ;;  %p72_p2 = scmp.eq.s32.totalorder %s4276_s27, 0 }
  0x1d   : > { %p3790_p3 = scmp.lt.s32.totalorder %s4276_s27, 2  ;;  %s4424_s19 = sand.u32 1, %s4272_s26  }
  0x1e   : > { %s4420_s30 = scalar_select %p62_p1, %s4272_s26, %s64_s29  }
  0x1f   : > { %p73_p4 = por %p72_p2, %p71_p0  ;;  %s3744_s1 = smul.u32 192, %s4424_s19 }
  0x20   : > { %5207 = sst [smem:[#allocation22_spill]] %s4420_s30  ;;  %s3745_s21 = smul.u32 3072, %s4276_s27 }
  0x21   : > { %p4427_p5 = pnand %p3790_p3, %p73_p4  ;;  %s5209_s28 = sld [smem:[#allocation24_spill]] }
  0x22   : > { %s531_s29 = scalar_lea.vmem [#allocation6], %s3744_s1  ;;  %s5210_s30 = sand.u32 1, %s4276_s27  }
  0x23   : > { %s5208_s20 = scalar_select %p4427_p5, 1, 0 }
  0x24   : > { %s538_s18 = sshll.u32 %s531_s29, 4  ;;  %s4441_s26 = scalar_lea.sflag [#allocation7], %s5210_s30  ;;  %s4437_s18 = int_to_ptr.vmem [resolvable:$true] %s538_s18 }
  0x25   : > { %p4447_p7 = pneg %p4427_p5 }
  0x27   : > { %s4435_s0 = scalar_lea.hbm %s5209_s28, %s3745_s21  ;;  %s4029_s1 = scalar_lea.hbm %s5209_s28, 6144 }
  0x28   : > { %s4024_s17 = scalar_lea.hbm %s4435_s0, 3072  ;;  %p4030_p10 = scmp.lt.u32.totalorder %s4435_s0, %s5209_s28 }
  0x29   : > { %p4025_p6 = scmp.ne.s32.totalorder %s4435_s0, %s4024_s17  ;;  %p4031_p11 = scmp.lt.u32.totalorder %s4029_s1, %s4024_s17 }
  0x2a   : > { %s5211_s16 = scalar_select %p4447_p7, 1, 0 }
  0x2b   : > { %p4027_p8 = pnand %p4447_p7, %p4025_p6  ;;  %p4032_p12 = por %p4031_p11, %p4030_p10 }
  0x2c   : > { %p4033_p13 = scmp.lt.u32.totalorder %s4024_s17, %s4435_s0 }
  0x2d   : > { %p4028_p9 = pneg %p4027_p8 }
  0x2e   : > { %p4034_p0 = por %p4033_p13, %p4032_p12 }
  0x30   : > { %p4035_p1 = pnand %p4034_p0, %p4028_p9 }
  0x32   : > { %4038 = shalt.err (!%p4035_p1)
}
  0x33   : > { %s4039_s30 = scalar_lea.vmem %s4437_s18, 3072  ;;  %s4278_s21 = smov [#allocation6]  }
  0x34   : > { %p4040_p2 = scmp.ne.s32.totalorder %s4437_s18, %s4039_s30  ;;  %s4044_s22 = sshll.u32 %s4278_s21, 4  ;;  %s4045_s22 = int_to_ptr.vmem [resolvable:$false] %s4044_s22 }
  0x35   : > { %s4046_s23 = scalar_lea.vmem %s4045_s22, 6144  ;;  %p4047_p6 = scmp.lt.s32.totalorder %s4437_s18, %s4045_s22 }
  0x36   : > { %p4042_p3 = pnand %p4040_p2, %p4447_p7  ;;  %p4048_p8 = scmp.lt.s32.totalorder %s4046_s23, %s4039_s30 }
  0x38   : > { %p4043_p4 = pneg %p4042_p3  ;;  %p4049_p10 = por %p4048_p8, %p4047_p6 }
  0x3a   : > { %p4050_p11 = pnand %p4049_p10, %p4043_p4 }
  0x3c   : > { %4053 = shalt.err (!%p4050_p11)
}
  0x3d   : > { %s4279_s17 = smov 192   ;;  %s4280_s1 = smov 12  }
  0x3e   : > { %3778 = dma.hbm_to_vmem [thread:$0]  (!%p4427_p5), %s4435_s0, 3072, %s4437_s18, %s4441_s26, %s4279_s17, %s4279_s17, %s4280_s1  }
  0x3f   : > { %s3341_s29 = sshll.u32 %s4424_s19, 7  ;;  %s3466_s21 = sshll.u32 %s4276_s27, 11 }
  0x40   : > { %s5212_s9 = sld [smem:[#allocation31_spill]]  ;;  %s610_s28 = scalar_lea.vmem [#allocation9], %s3341_s29 }
  0x41   : > { %s617_s14 = sshll.u32 %s610_s28, 4  ;;  %s5213_s13 = sand.u32 1, %s4276_s27   ;;  %s4482_s14 = int_to_ptr.vmem [resolvable:$true] %s617_s14 }
  0x42   : > { %s4486_s12 = scalar_lea.sflag [#allocation10], %s5213_s13 }
  0x46   : > { %s4478_s23 = scalar_lea.hbm %s5212_s9, %s3466_s21  ;;  %s4059_s1 = scalar_lea.hbm %s5212_s9, 4096 }
  0x47   : > { %s4054_s18 = scalar_lea.hbm %s4478_s23, 2048  ;;  %p4060_p0 = scmp.lt.u32.totalorder %s4478_s23, %s5212_s9 }
  0x48   : > { %p4055_p9 = scmp.ne.s32.totalorder %s4478_s23, %s4054_s18  ;;  %p4061_p1 = scmp.lt.u32.totalorder %s4059_s1, %s4054_s18 }
  0x49   : > { %p4063_p3 = scmp.lt.u32.totalorder %s4054_s18, %s4478_s23 }
  0x4a   : > { %p4057_p12 = pnand %p4055_p9, %p4447_p7  ;;  %p4062_p2 = por %p4061_p1, %p4060_p0 }
  0x4c   : > { %p4058_p13 = pneg %p4057_p12  ;;  %p4064_p4 = por %p4063_p3, %p4062_p2 }
  0x4e   : > { %p4065_p6 = pnand %p4064_p4, %p4058_p13 }
  0x50   : > { %4068 = shalt.err (!%p4065_p6)
}
  0x51   : > { %s4069_s13 = scalar_lea.vmem %s4482_s14, 2048  ;;  %s4281_s28 = smov [#allocation9]  }
  0x52   : > { %p4070_p8 = scmp.ne.s32.totalorder %s4482_s14, %s4069_s13  ;;  %s4074_s0 = sshll.u32 %s4281_s28, 4  ;;  %s4075_s0 = int_to_ptr.vmem [resolvable:$false] %s4074_s0 }
  0x53   : > { %s4076_s17 = scalar_lea.vmem %s4075_s0, 4096  ;;  %p4077_p9 = scmp.lt.s32.totalorder %s4482_s14, %s4075_s0 }
  0x54   : > { %p4072_p10 = pnand %p4070_p8, %p4447_p7  ;;  %p4078_p12 = scmp.lt.s32.totalorder %s4076_s17, %s4069_s13 }
  0x56   : > { %p4073_p11 = pneg %p4072_p10  ;;  %p4079_p0 = por %p4078_p12, %p4077_p9 }
  0x58   : > { %p4080_p1 = pnand %p4079_p0, %p4073_p11 }
  0x5a   : > { %4083 = shalt.err (!%p4080_p1)
}
  0x5b   : > { %s5179_s18 = smov 128   ;;  %s5180_s1 = smov 8  }
  0x5c   : > { %3784 = dma.hbm_to_vmem [thread:$0]  (!%p4427_p5), %s4478_s23, 2048, %s4482_s14, %s4486_s12, %s5179_s18, %s5179_s18, %s5180_s1  }
  0x5d   : > { %s5214_s11 = sld [smem:[#allocation33_spill]]  ;;  %s638_s28 = scalar_lea.vmem [#allocation11], %s3341_s29 }
  0x5e   : > { %s645_s0 = sshll.u32 %s638_s28, 4  ;;  %s4525_s17 = sadd.s32 4294967295, %s4276_s27   ;;  %s4522_s0 = int_to_ptr.vmem [resolvable:$true] %s645_s0 }
  0x5f   : > { %p77_p13 = scmp.ne.s32.totalorder %s4268_s25, %s4264_s24  ;;  %p5181_p2 = scmp.eq.s32.totalorder %s4525_s17, 0 }
  0x60   : > { %p3333_p3 = scmp.ge.s32.totalorder %s4276_s27, 1  ;;  %p479_p4 = scmp.lt.s32.totalorder %s4276_s27, 3 }
  0x61   : > { %p4534_p6 = por %p5181_p2, %p77_p13  ;;  %s4285_s24 = smov [#allocation12]  }
  0x62   : > { %p4539_p10 = pnand %p3333_p3, %p479_p4  ;;  %s510_s30 = sshll.u32 %s4285_s24, 4  ;;  %s4551_s30 = int_to_ptr.vmem [resolvable:$true] %s510_s30 }
  0x63   : > { %s4518_s13 = scalar_lea.hbm %s5214_s11, %s3466_s21  ;;  %s4284_s21 = smov [#allocation3]  }
  0x64   : > { %s5215_s14 = scalar_select %p4534_p6, 1, 0 }
  0x65   : > { %s5216_s29 = scalar_select %p4539_p10, 1, 0 }
  0x66   : > { %s491_s23 = sshll.u32 %s4284_s21, 4  ;;  %p3768_p11 = pneg %p4539_p10  ;;  %s492_s23 = int_to_ptr.vmem [resolvable:$true] %s491_s23 }
  0x67   : > { %s5218_s9 = sld [smem:[#allocation23_spill]] }
  0x68   : > { %p4547_p9 = pnand %p3768_p11, %p5181_p2 }
  0x6a   : > { %p4086_p0 = pneg %p4547_p9 }
  0x6d   : > { %s4084_s10 = scalar_lea.hbm %s5218_s9, 512 }
  0x6e   : > { %p4085_p12 = scmp.ne.s32.totalorder %s5218_s9, %s4084_s10  ;;  %p4091_p3 = scmp.lt.u32.totalorder %s4084_s10, %s5218_s9 }
  0x70   : > { %p4087_p1 = pnand %p4086_p0, %p4085_p12 }
  0x72   : > { %p4088_p13 = pneg %p4087_p1 }
  0x74   : > { %p4093_p4 = pnand %p4091_p3, %p4088_p13 }
  0x76   : > { %4096 = shalt.err (!%p4093_p4)
}
  0x77   : > { %s4097_s28 = scalar_lea.vmem %s492_s23, 512  ;;  %p4105_p6 = scmp.lt.s32.totalorder %s492_s23, %s492_s23 }
  0x78   : > { %p4098_p11 = scmp.ne.s32.totalorder %s492_s23, %s4097_s28  ;;  %p4106_p10 = scmp.lt.s32.totalorder %s4097_s28, %s4097_s28 }
  0x7a   : > { %p4100_p8 = pnand %p4098_p11, %p4086_p0  ;;  %p4107_p5 = por %p4106_p10, %p4105_p6 }
  0x7c   : > { %p4101_p2 = pneg %p4100_p8 }
  0x7e   : > { %p4108_p7 = pnand %p4107_p5, %p4101_p2 }
  0x80   : > { %4111 = shalt.err (!%p4108_p7)
}
  0x81   : > { %s5219_s8 = smov 8   ;;  %s5220_s18 = smov 128  }
  0x82   : > { %3771 = dma.hbm_to_vmem [thread:$0]  (!%p4547_p9), %s5218_s9, 512, %s492_s23, [#allocation4], %s5220_s18, %s5220_s18, %s5219_s8  }
  0x83   : > { %s4112_s24 = scalar_lea.hbm %s5169_s15, 1024 }
  0x84   : > { %p4113_p6 = scmp.ne.s32.totalorder %s5169_s15, %s4112_s24  ;;  %p4119_p2 = scmp.lt.u32.totalorder %s4112_s24, %s5169_s15 }
  0x86   : > { %p4115_p5 = pnand %p4113_p6, %p4086_p0 }
  0x88   : > { %p4116_p7 = pneg %p4115_p5 }
  0x8a   : > { %p4121_p8 = pnand %p4119_p2, %p4116_p7 }
  0x8c   : > { %4124 = shalt.err (!%p4121_p8)
}
  0x8d   : > { %s4125_s23 = scalar_lea.vmem %s4551_s30, 1024  ;;  %p4133_p13 = scmp.lt.s32.totalorder %s4551_s30, %s4551_s30 }
  0x8e   : > { %p4126_p10 = scmp.ne.s32.totalorder %s4551_s30, %s4125_s23  ;;  %p4134_p3 = scmp.lt.s32.totalorder %s4125_s23, %s4125_s23 }
  0x90   : > { %p4128_p12 = pnand %p4126_p10, %p4086_p0  ;;  %p4135_p4 = por %p4134_p3, %p4133_p13 }
  0x92   : > { %p4129_p1 = pneg %p4128_p12 }
  0x94   : > { %p4136_p11 = pnand %p4135_p4, %p4129_p1 }
  0x96   : > { %4139 = shalt.err (!%p4136_p11)
}
  0x97   : > { %s4286_s2 = smov 64   ;;  %s4287_s5 = smov 4  }
  0x98   : > { %3774 = dma.hbm_to_vmem [thread:$0]  (!%p4547_p9), %s5169_s15, 1024, %s4551_s30, [#allocation13], %s4286_s2, %s4286_s2, %s4287_s5  }
  0x99   : > { %s3465_s18 = sshll.u32 %s4276_s27, 10  ;;  %s5221_s7 = sshll.u32 %s4424_s19, 6 }
  0x9a   : > { %s559_s10 = scalar_lea.vmem [#allocation8], %s5221_s7  ;;  %s5222_s3 = sld [smem:[#allocation26_spill]] }
  0x9b   : > { %s566_s1 = sshll.u32 %s559_s10, 4  ;;  %p5223_p6 = scmp.ne.s32.totalorder %s5211_s16, 0  ;;  %s4615_s1 = int_to_ptr.vmem [resolvable:$true] %s566_s1 }
  0xa0   : > { %s4613_s28 = scalar_lea.hbm %s5222_s3, %s3465_s18  ;;  %s4145_s30 = scalar_lea.hbm %s5222_s3, 2048 }
  0xa1   : > { %s4140_s22 = scalar_lea.hbm %s4613_s28, 1024  ;;  %p4146_p7 = scmp.lt.u32.totalorder %s4613_s28, %s5222_s3 }
  0xa2   : > { %p4141_p0 = scmp.ne.s32.totalorder %s4613_s28, %s4140_s22  ;;  %p4147_p2 = scmp.lt.u32.totalorder %s4145_s30, %s4140_s22 }
  0xa3   : > { %p4149_p10 = scmp.lt.u32.totalorder %s4140_s22, %s4613_s28 }
  0xa4   : > { %p4143_p5 = pnand %p4141_p0, %p5223_p6  ;;  %p4148_p8 = por %p4147_p2, %p4146_p7 }
  0xa6   : > { %p4144_p9 = pneg %p4143_p5  ;;  %p4150_p12 = por %p4149_p10, %p4148_p8 }
  0xa8   : > { %p4151_p1 = pnand %p4150_p12, %p4144_p9 }
  0xaa   : > { %4154 = shalt.err (!%p4151_p1)
}
  0xab   : > { %s4155_s8 = scalar_lea.vmem %s4615_s1, 1024  ;;  %s4288_s18 = smov [#allocation8]  }
  0xac   : > { %p4156_p13 = scmp.ne.s32.totalorder %s4615_s1, %s4155_s8  ;;  %s4160_s7 = sshll.u32 %s4288_s18, 4  ;;  %s4161_s7 = int_to_ptr.vmem [resolvable:$false] %s4160_s7 }
  0xad   : > { %s4162_s10 = scalar_lea.vmem %s4161_s7, 2048  ;;  %p4163_p11 = scmp.lt.s32.totalorder %s4615_s1, %s4161_s7 }
  0xae   : > { %p4158_p3 = pnand %p4156_p13, %p5223_p6  ;;  %p4164_p0 = scmp.lt.s32.totalorder %s4162_s10, %s4155_s8 }
  0xb0   : > { %p4159_p4 = pneg %p4158_p3  ;;  %p4165_p5 = por %p4164_p0, %p4163_p11 }
  0xb2   : > { %p4166_p7 = pnand %p4165_p5, %p4159_p4 }
  0xb4   : > { %4169 = shalt.err (!%p4166_p7)
}
  0xb5   : > { %p5224_p9 = scmp.ne.s32.totalorder %s5208_s20, 0  ;;  %s4170_s21 = scalar_lea.hbm %s4518_s13, 2048 }
  0xb6   : > { %p4171_p2 = scmp.ne.s32.totalorder %s4518_s13, %s4170_s21  ;;  %s4175_s27 = scalar_lea.hbm %s5214_s11, 4096 }
  0xb7   : > { %3781 = dma.hbm_to_vmem [thread:$0]  (!%p5224_p9), %s4613_s28, 1024, %s4615_s1, %s4441_s26, %s4286_s2, %s4286_s2, %s4287_s5  }
  0xb8   : > { %p4173_p8 = pnand %p4171_p2, %p5223_p6  ;;  %p4176_p12 = scmp.lt.u32.totalorder %s4518_s13, %s5214_s11 }
  0xb9   : > { %p4177_p1 = scmp.lt.u32.totalorder %s4175_s27, %s4170_s21  ;;  %p4179_p3 = scmp.lt.u32.totalorder %s4170_s21, %s4518_s13 }
  0xba   : > { %p4174_p10 = pneg %p4173_p8 }
  0xbb   : > { %p4178_p13 = por %p4177_p1, %p4176_p12 }
  0xbd   : > { %p4180_p4 = por %p4179_p3, %p4178_p13 }
  0xbf   : > { %p4181_p11 = pnand %p4180_p4, %p4174_p10 }
  0xc1   : > { %4184 = shalt.err (!%p4181_p11)
}
  0xc2   : > { %s4185_s26 = scalar_lea.vmem %s4522_s0, 2048  ;;  %s4289_s1 = smov [#allocation11]  }
  0xc3   : > { %p4186_p0 = scmp.ne.s32.totalorder %s4522_s0, %s4185_s26  ;;  %s4190_s28 = sshll.u32 %s4289_s1, 4  ;;  %s4191_s28 = int_to_ptr.vmem [resolvable:$false] %s4190_s28 }
  0xc4   : > { %s4192_s23 = scalar_lea.vmem %s4191_s28, 4096  ;;  %p4193_p2 = scmp.lt.s32.totalorder %s4522_s0, %s4191_s28 }
  0xc5   : > { %p4188_p5 = pnand %p4186_p0, %p5223_p6  ;;  %p4194_p8 = scmp.lt.s32.totalorder %s4192_s23, %s4185_s26 }
  0xc7   : > { %p4189_p7 = pneg %p4188_p5  ;;  %p4195_p12 = por %p4194_p8, %p4193_p2 }
  0xc9   : > { %p4196_p1 = pnand %p4195_p12, %p4189_p7 }
  0xcb   : > { %4199 = shalt.err (!%p4196_p1)
}
  0xcc   : > { %3787 = dma.hbm_to_vmem [thread:$0]  (!%p5224_p9), %s4518_s13, 2048, %s4522_s0, %s4486_s12, %s4286_s2, %s4286_s2, %s4287_s5  }
  0xcd   : > { %p5225_p6 = scmp.ne.s32.totalorder %s5216_s29, 0 }
  0xce   : > { %p5226_p10 = scmp.eq.s32.totalorder (!%p5225_p6), %s4525_s17, 0 }
  0xcf   : > { %663 = sbr.rel (%p5225_p6) target bundleno = 4939 (0x134b), region = 88 }
  0xd6   : > { %4243 = dma.done.wait (%p5226_p10), [#allocation4], 512   ;;  %p5227_p13 = pmov %p5226_p10 }
  0xd7   : > { %s669_s16 = sand.u32 1, %s4525_s17   ;;  %s671_s20 = sand.u32 1, %s4268_s25  }
  0xd8   : > { %4245 = vsyncadd (%p5227_p13), [#allocation4], 4294966784  ;;  %s3746_s6 = smul.u32 192, %s671_s20  ;;  %s670_s8 = scalar_lea.sflag [#allocation7], %s669_s16 }
  0xd9   : > { %p5228_p3 = scmp.ne.s32.totalorder %s5215_s14, 0 }
  0xda   : > { %s4675_s18 = scalar_lea.vmem [#allocation6], %s3746_s6 }
  0xdb   : > { %4247 = dma.done.wait (%p5228_p3), %s670_s8, 4096  }
  0xdc   : > { %4249 = vsyncadd (%p5228_p3), %s670_s8, 4294963200  ;;  %s3349_s12 = sshll.u32 %s671_s20, 6  ;;  %s3350_s13 = sshll.u32 %s671_s20, 7 }
  0xdd   : > { %s4681_s0 = scalar_lea.vmem [#allocation8], %s3349_s12  ;;  %s688_s29 = scalar_lea.sflag [#allocation10], %s669_s16 }
  0xde   : > { %s4683_s2 = scalar_lea.vmem [#allocation9], %s3350_s13 }
  0xdf   : > { %4251 = dma.done.wait (%p5228_p3), %s688_s29, 4096  }
  0xe0   : > { %4253 = vsyncadd (%p5228_p3), %s688_s29, 4294963200  ;;  %s4689_s5 = scalar_lea.vmem [#allocation11], %s3350_s13  ;;  %p5229_p9 = pmov %p5226_p10 }
  0xe2   : > { %4255 = dma.done.wait (%p5229_p9), [#allocation13], 1024   ;;  %p5230_p4 = pmov %p5229_p9 }
  0xe3   : > { %p791_p11 = scmp.lt.s32.totalorder %s4525_s17, 1  ;;  %s5232_s28 = sld [smem:[#allocation28_spill]] }
  0xe4   : > { %4257 = vsyncadd (%p5230_p4), [#allocation13], 4294966272  ;;  %s5233_s6 = sld [smem:[#allocation25_spill]]  ;;  %s5234_s29 = sld [smem:[#allocation29_spill]] }
  0xe5   : > { %s4697_s7 = scalar_select %p791_p11, %s4525_s17, 1 }
  0xe6   : > { %s5235_s21 = sld [smem:[#allocation30_spill]]  ;;  %s5236_s19 = sld [smem:[#allocation32_spill]] }
  0xe7   : > { %s3747_s14 = smul.u32 3, %s4697_s7  ;;  %s3353_s11 = sshll.u32 %s4697_s7, 1 }
  0xe8   : > { %p5238_p0 = scmp.ne.s32.totalorder %s4525_s17, 0 }
  0xe9   : > { %s803_s23 = scalar_lea.vmem %s5232_s28, %s4697_s7  ;;  %s5237_s28 = sld [smem:[#allocation34_spill]]  ;;  %v822_v0 = vld [vmem:[#allocation3] sm:$0xff] (!%p5238_p0)  ;;  %v823_v1 = vld [vmem:[#allocation3 + $0x8] sm:$0xff] (!%p5238_p0)  ;;  %v824_v2 = vld [vmem:[#allocation3 + $0x10] sm:$0xff] (!%p5238_p0) }
  0xea   : > { %s4715_s8 = scalar_lea.vmem %s5233_s6, %s3747_s14  ;;  %s806_s3 = scalar_lea.vmem %s5234_s29, %s4697_s7  ;;  %826 = vst [vmem:[#allocation2] sm:$0xff] (!%p5238_p0), %v822_v0  ;;  %827 = vst [vmem:[#allocation2 + $0x8] sm:$0xff] (!%p5238_p0), %v823_v1  ;;  %v825_v3 = vld [vmem:[#allocation3 + $0x18] sm:$0xff] (!%p5238_p0) }
  0xeb   : > { %821 = sbr.rel (%p5238_p0) target bundleno = 242 (0xf2), region = 116  ;;  %828 = vst [vmem:[#allocation2 + $0x10] sm:$0xff] (!%p5238_p0), %v824_v2  ;;  %829 = vst [vmem:[#allocation2 + $0x18] sm:$0xff] (!%p5238_p0), %v825_v3 }
  0xec   : > { %s809_s24 = scalar_lea.vmem %s5235_s21, %s4697_s7  ;;  %s4729_s30 = scalar_lea.vmem %s5236_s19, %s3353_s11 }
  0xef   : > { %s816_s16 = scalar_lea.vmem %s5237_s28, %s4697_s7 }
  0xf2 PF: > { %v830_v4 = vld [vmem:[#allocation2] sm:$0xff]  ;;  %v832_v5 = vld [vmem:[#allocation2 + $0x10] sm:$0xff]  ;;  %v831_v6 = vld [vmem:[#allocation2 + $0x8] sm:$0xff]  ;;  %v4290_v43 = vmov 0   ;;  %vm4292_vm0 = vmmov 0   ;;  %vm1204_vm1 = vcmask 261120   ;;  %s5242_s10 = scalar_lea.vmem %s5158_s4, %s4697_s7 }
  0xf3   : > { %836 = vadd.xlane.f32.xlu0 %v830_v4  ;;  %840 = vadd.xlane.f32.xlu1 %v832_v5  ;;  %v833_v7 = vld [vmem:[#allocation2 + $0x18] sm:$0xff]  ;;  %v3844_v8 = vld [vmem:[%s4675_s18 + $0x4] ss:$12 sps:$4 sm:$0xff]   ;;  %v3846_v9 = vld [vmem:[%s4675_s18] ss:$12 sps:$4 sm:$0xff]   ;;  %vm1303_vm2 = vcmask 130048  }
  0xf4   : > { %v3847_v10 = vld [vmem:[%s4675_s18 + $0x1c] ss:$12 sps:$4 sm:$0xff]   ;;  %1080 = vmatprep.subr.bf16.mxu0 %v3844_v8  ;;  %v3850_v28 = vld [vmem:[%s4675_s18 + $0x18] ss:$12 sps:$4 sm:$0xff]   ;;  %v3851_v29 = vld [vmem:[%s4675_s18 + $0x34] ss:$12 sps:$4 sm:$0xff]   ;;  %1112 = vmatprep.mubr.bf16.mxu0 %v4290_v43 }
  0xf5   : > { %v3849_v11 = vld [vmem:[%s4675_s18 + $0x8] ss:$12 sps:$4 sm:$0xff]   ;;  %1081 = vmatpush1.bf16.msra.mxu0 %v3846_v9  ;;  %v3853_v30 = vld [vmem:[%s4675_s18 + $0x20] ss:$12 sps:$4 sm:$0xff]   ;;  %v3854_v31 = vld [vmem:[%s4675_s18 + $0x30] ss:$12 sps:$4 sm:$0xff]  }
  0xf6   : > { %3564 = vmatprep.subr.bf16.mxu1 %v3849_v11  ;;  %1082 = vmatprep.subr.bf16.mxu0 %v3847_v10  ;;  %v3855_v32 = vld [vmem:[%s4675_s18 + $0x4c] ss:$12 sps:$4 sm:$0xff]   ;;  %v3858_v34 = vld [vmem:[%s4675_s18 + $0x48] ss:$12 sps:$4 sm:$0xff]   ;;  %v3859_v35 = vld [vmem:[%s4675_s18 + $0x64] ss:$12 sps:$4 sm:$0xff]  }
  0xf7   : > { %838 = vadd.xlane.f32.xlu0 %v831_v6  ;;  %842 = vadd.xlane.f32.xlu1 %v833_v7  ;;  %v3857_v33 = vld [vmem:[%s4675_s18 + $0x38] ss:$12 sps:$4 sm:$0xff]   ;;  %v3861_v36 = vld [vmem:[%s4675_s18 + $0x50] ss:$12 sps:$4 sm:$0xff]   ;;  %v3862_v37 = vld [vmem:[%s4675_s18 + $0x60] ss:$12 sps:$4 sm:$0xff]  }
  0xf8   : > { %3565 = vmatpush3.bf16.msra.mxu1 %v3849_v11  ;;  %v3863_v38 = vld [vmem:[%s4675_s18 + $0x7c] ss:$12 sps:$4 sm:$0xff]   ;;  %v3866_v40 = vld [vmem:[%s4675_s18 + $0x78] ss:$12 sps:$4 sm:$0xff]   ;;  %v3867_v41 = vld [vmem:[%s4675_s18 + $0x94] ss:$12 sps:$4 sm:$0xff]  }
  0xf9   : > { %1083 = vmatpush1.bf16.msra.mxu0 %v3850_v28  ;;  %3566 = vmatprep.subr.bf16.mxu1 %v3853_v30  ;;  %v3865_v39 = vld [vmem:[%s4675_s18 + $0x68] ss:$12 sps:$4 sm:$0xff]   ;;  %v3869_v42 = vld [vmem:[%s4675_s18 + $0x80] ss:$12 sps:$4 sm:$0xff]   ;;  %v3870_v44 = vld [vmem:[%s4675_s18 + $0x90] ss:$12 sps:$4 sm:$0xff]  }
  0xfa   : > { %1084 = vmatprep.subr.bf16.mxu0 %v3851_v29  ;;  %v3871_v45 = vld [vmem:[%s4675_s18 + $0xac] ss:$12 sps:$4 sm:$0xff]   ;;  %v3874_v47 = vld [vmem:[%s4675_s18 + $0xa8] ss:$12 sps:$4 sm:$0xff]   ;;  %v3875_v48 = vld [vmem:[%s4675_s18 + $0xb0] ss:$12 sps:$4 sm:$0xff]  }
  0xfb   : > { %v3873_v46 = vld [vmem:[%s4675_s18 + $0x98] ss:$12 sps:$4 sm:$0xff]   ;;  %s5239_s18 = sld [smem:[#allocation27_spill]]  ;;  %s4295_s13 = smov 32  }
  0xfc   : > { %3567 = vmatpush3.bf16.msra.mxu1 %v3853_v30  ;;  %p3449_p5 = scmp.ne.s32.totalorder %s4525_s17, 1 }
  0xfd   : > { %1085 = vmatpush1.bf16.msra.mxu0 %v3854_v31  ;;  %3568 = vmatprep.subr.bf16.mxu1 %v3857_v33  ;;  %s5246_s1 = sld [smem:[#allocation35_spill]] (!%p3449_p5)  ;;  %s5247_s9 = sld [smem:[#allocation36_spill]] (!%p3449_p5) }
  0xfe   : > { %1086 = vmatprep.subr.bf16.mxu0 %v3855_v32 }
 0x100   : > { %3569 = vmatpush3.bf16.msra.mxu1 %v3857_v33 }
 0x101   : > { %1087 = vmatpush1.bf16.msra.mxu0 %v3858_v34  ;;  %3570 = vmatprep.subr.bf16.mxu1 %v3861_v36  ;;  %s5240_s14 = scalar_lea.vmem %s5239_s18, %s4697_s7 }
 0x102   : > { %1088 = vmatprep.subr.bf16.mxu0 %v3859_v35  ;;  %v3355_v63 = vld [vmem:[%s5240_s14] ss:$0 sm:$0xff]  ;;  %s5248_s14 = sld [smem:[#allocation37_spill]] (!%p3449_p5) }
 0x104   : > { %3571 = vmatpush3.bf16.msra.mxu1 %v3861_v36 }
 0x105   : > { %1089 = vmatpush1.bf16.msra.mxu0 %v3862_v37  ;;  %3572 = vmatprep.subr.bf16.mxu1 %v3865_v39 }
 0x106   : > { %1090 = vmatprep.subr.bf16.mxu0 %v3863_v38 }
 0x108   : > { %3573 = vmatpush3.bf16.msra.mxu1 %v3865_v39 }
 0x109   : > { %1091 = vmatpush1.bf16.msra.mxu0 %v3866_v40  ;;  %3574 = vmatprep.subr.bf16.mxu1 %v3869_v42 }
 0x10a   : > { %1092 = vmatprep.subr.bf16.mxu0 %v3867_v41 }
 0x10c   : > { %3575 = vmatpush3.bf16.msra.mxu1 %v3869_v42 }
 0x10d   : > { %1093 = vmatpush1.bf16.msra.mxu0 %v3870_v44  ;;  %3576 = vmatprep.subr.bf16.mxu1 %v3873_v46 }
 0x10e   : > { %1094 = vmatprep.subr.bf16.mxu0 %v3871_v45 }
 0x110   : > { %3577 = vmatpush3.bf16.msra.mxu1 %v3873_v46 }
 0x111   : > { %1095 = vmatpush1.bf16.msra.mxu0 %v3874_v47  ;;  %3578 = vmatprep.subr.bf16.mxu1 %v3875_v48 }
 0x114   : > { %3579 = vmatpush3.bf16.msra.mxu1 %v3875_v48 }
 0x180   : > { %v837_v12 = vpop.xlane.xlu0 %836  ;;  %v841_v13 = vpop.xlane.xlu1 %840 }
 0x181   : > { %v845_v14 = vmul.f32 0.0078125, %v837_v12  ;;  %v847_v15 = vmul.f32 0.0078125, %v841_v13 }
 0x183   : > { %v4741_v16 = vsub.f32 %v830_v4, %v845_v14  ;;  %v4743_v17 = vsub.f32 %v832_v5, %v847_v15  ;;  %v3356_v4 = vld [vmem:[%s803_s23] ss:$0 sm:$0xff]  ;;  %s4293_s23 = smov 96  }
 0x184   : > { %v839_v18 = vpop.xlane.xlu0 %838  ;;  %v843_v19 = vpop.xlane.xlu1 %842 }
 0x185   : > { %v846_v20 = vmul.f32 0.0078125, %v839_v18  ;;  %v853_v21 = vmul.f32 %v4741_v16, %v4741_v16  ;;  %v848_v22 = vmul.f32 0.0078125, %v843_v19  ;;  %v855_v25 = vmul.f32 %v4743_v17, %v4743_v17 }
 0x186   : > { %v937_v18 = vlaneseq }
 0x187   : > { %v4747_v23 = vsub.f32 %v831_v6, %v846_v20  ;;  %857 = vadd.xlane.f32.xlu0 %v853_v21  ;;  %v4749_v24 = vsub.f32 %v833_v7, %v848_v22  ;;  %v935_v21 = vld [vmem:[%s4715_s8] sm:$0x7]  ;;  %s4294_s8 = smov 64  }
 0x188   : > { %v4799_v19 = vshrl.u32 %v937_v18, 7 }
 0x189   : > { %v854_v26 = vmul.f32 %v4747_v23, %v4747_v23  ;;  %v856_v27 = vmul.f32 %v4749_v24, %v4749_v24 }
 0x18a   : > { %v939_v20 = vsub.s32 0, %v4799_v19  ;;  %v943_v22 = vsub.s32 1, %v4799_v19 }
 0x18b   : > { %861 = vadd.xlane.f32.xlu0 %v855_v25  ;;  %859 = vadd.xlane.f32.xlu1 %v854_v26 }
 0x18c   : > { %v944_v26 = vrot.slane %v935_v21, %v943_v22 }
 0x18f   : > { %863 = vadd.xlane.f32.xlu1 %v856_v27 }
 0x214   : > { %v858_v49 = vpop.xlane.xlu0 %857 }
 0x215   : > { %v865_v50 = vmul.f32 0.0078125, %v858_v49 }
 0x217   : > { %v869_v51 = vadd.f32 1e-05, %v865_v50 }
 0x218   : > { %v860_v52 = vpop.xlane.xlu1 %859  ;;  %v862_v53 = vpop.xlane.xlu0 %861 }
 0x219   : > { %3924 = vrsqrt.f32 %v869_v51  ;;  %v866_v54 = vmul.f32 0.0078125, %v860_v52  ;;  %v867_v55 = vmul.f32 0.0078125, %v862_v53 }
 0x21b   : > { %v870_v56 = vadd.f32 1e-05, %v866_v54  ;;  %v871_v57 = vadd.f32 1e-05, %v867_v55 }
 0x21c   : > { %v864_v58 = vpop.xlane.xlu1 %863 }
 0x21d   : > { %3926 = vrsqrt.f32 %v870_v56  ;;  %v868_v59 = vmul.f32 0.0078125, %v864_v58 }
 0x21e   : > { %3928 = vrsqrt.f32 %v871_v57 }
 0x21f   : > { %v872_v60 = vadd.f32 1e-05, %v868_v59 }
 0x221   : > { %3930 = vrsqrt.f32 %v872_v60 }
 0x223   : > { %v3925_v61 = vpop.eup %3924 }
 0x224   : > { %v877_v62 = vmul.f32 %v3925_v61, %v4741_v16 }
 0x226   : > { %v887_v3 = vmul.f32 %v3355_v63, %v877_v62 }
 0x227   : > { %v3927_v0 = vpop.eup %3926 }
 0x228   : > { %v3929_v1 = vpop.eup %3928  ;;  %v878_v2 = vmul.f32 %v3927_v0, %v4747_v23  ;;  %v897_v8 = vadd.f32 %v3356_v4, %v887_v3  ;;  %v940_v23 = vrot.slane %v935_v21, %v939_v20 }
 0x229   : > { %v879_v5 = vmul.f32 %v3929_v1, %v4743_v17  ;;  %v4291_v17 = vmov 0.0  }
 0x22a   : > { %v888_v6 = vmul.f32 %v3355_v63, %v878_v2  ;;  %3584 = vmatprep.subr.bf16.mxu1 %v4291_v17  ;;  %3590 = vmatprep.subr.bf16.mxu0 %v4291_v17 }
 0x22b   : > { %v3931_v7 = vpop.eup %3930  ;;  %v889_v11 = vmul.f32 %v3355_v63, %v879_v5 }
 0x22c   : > { %v898_v9 = vadd.f32 %v3356_v4, %v888_v6  ;;  %v880_v10 = vmul.f32 %v3931_v7, %v4749_v24  ;;  %v947_v24 = vsub.s32 2, %v4799_v19 }
 0x22d   : > { %v899_v14 = vadd.f32 %v3356_v4, %v889_v11 }
 0x22e   : > { %v901_v12 = vpack.c.bf16 %v898_v9, %v897_v8  ;;  %v890_v13 = vmul.f32 %v3355_v63, %v880_v10  ;;  %v948_v32 = vrot.slane %v935_v21, %v947_v24 }
 0x230   : > { %1113 = vmatmul.mubr.bf16.vlgmr.msra.gmra.mrb[0].mxu0 %v901_v12  ;;  %3580 = vmatprep.mubr.bf16.mxu1 %v901_v12  ;;  %v900_v15 = vadd.f32 %v3356_v4, %v890_v13 }
 0x231   : > { %1122 = vmatprep.mubr.bf16.mxu0 %v4290_v43 }
 0x232   : > { %v902_v16 = vpack.c.bf16 %v900_v15, %v899_v14 }
 0x234   : > { %3581 = vmatmul.mubr.bf16.vlgmr.msra.gmra.mrb[0].mxu1 %v902_v16 }
 0x235   : > { %3586 = vmatprep.mubr.msk.bf16.mxu1 %vm4292_vm0, %v4291_v17 }
 0x238   : > { %1123 = vmatmul.mubr.bf16.gmra.mrb[4].mxu0 %v902_v16 }
 0x239   : > { %3592 = vmatprep.mubr.msk.bf16.mxu0 %vm4292_vm0, %v4291_v17 }
 0x303   : > { %v1114_v25 = vpop.f32.mrb[0].mxu0 }
 0x304   : > { %v1116_v27 = vpop.f32.mrb[1].mxu0  ;;  %v1115_v29 = vadd.f32 %v1114_v25, %v940_v23 }
 0x305   : > { %v1118_v28 = vpop.f32.mrb[2].mxu0  ;;  %v1117_v33 = vadd.f32 %v1116_v27, %v944_v26 }
 0x306   : > { %v1119_v30 = vadd.f32 %v1118_v28, %v940_v23  ;;  %v1120_v31 = vpop.f32.mrb[3].mxu0 }
 0x307   : > { %v1121_v34 = vadd.f32 %v1120_v31, %v944_v26  ;;  %v3582_v35 = vpop.f32.mrb[0].mxu1 }
 0x308   : > { %v4809_v36 = vpack.c.bf16 %v1119_v30, %v1115_v29  ;;  %v1167_v37 = vpop.f32.mrb[1].mxu1  ;;  %v1176_v40 = vadd.f32 %v3582_v35, %v948_v32 }
 0x309   : > { %v4811_v38 = vpack.c.bf16 %v1121_v34, %v1117_v33  ;;  %v3583_v39 = vpop.f32.mrb[2].mxu1  ;;  %v1168_v44 = vadd.f32 %v1167_v37, %v948_v32 }
 0x30a   : > { %v1179_v41 = vadd.f32 %v3583_v39, %v948_v32  ;;  %v1170_v42 = vpop.f32.mrb[3].mxu1 }
 0x30b   : > { %v1171_v45 = vadd.f32 %v1170_v42, %v948_v32  ;;  %v1124_v46 = vpop.f32.mrb[4].mxu0  ;;  %v1209_v47 = vsel %vm1204_vm1, %v4811_v38, 0 }
 0x30c   : > { %v4815_v48 = vpack.c.bf16 %v1179_v41, %v1176_v40  ;;  %v1126_v49 = vpop.f32.mrb[5].mxu0  ;;  %3585 = vmatpush3.bf16.xpose.msra.mxu1 %v1209_v47  ;;  %v1125_v52 = vadd.f32 %v1124_v46, %v940_v23 }
 0x30d   : > { %v4817_v50 = vpack.c.bf16 %v1171_v45, %v1168_v44  ;;  %v1128_v51 = vpop.f32.mrb[6].mxu0  ;;  %3596 = vmatprep.subr.bf16.mxu1 %v4291_v17  ;;  %v1127_v55 = vadd.f32 %v1126_v49, %v944_v26 }
 0x30e   : > { %v1129_v53 = vadd.f32 %v1128_v51, %v940_v23  ;;  %v1130_v54 = vpop.f32.mrb[7].mxu0 }
 0x30f   : > { %v1131_v56 = vadd.f32 %v1130_v54, %v944_v26 }
 0x310   : > { %v4820_v57 = vpack.c.bf16 %v1129_v53, %v1125_v52 }
 0x311   : > { %v4822_v58 = vpack.c.bf16 %v1131_v56, %v1127_v55 }
 0x313   : > { %3587 = vmatmul.mubr.msk.bf16.vlgmr.msra.gmra.mrb[4].mxu1 %vm1204_vm1, %v4809_v36  ;;  %v1256_v59 = vsel %vm1204_vm1, %v4822_v58, 0 }
 0x314   : > { %3591 = vmatpush3.bf16.xpose.msra.mxu0 %v1256_v59  ;;  %3597 = vmatpush3.bf16.msra.mxu1 %v4817_v50 }
 0x315   : > { %3602 = vmatprep.subr.bf16.mxu0 %v4291_v17  ;;  %3598 = vmatprep.mubr.msk.bf16.mxu1 %vm4292_vm0, %v4291_v17 }
 0x316   : > { %3608 = vmatprep.subr.bf16.mxu1 %v4291_v17 }
 0x31b   : > { %3593 = vmatmul.mubr.msk.bf16.vlgmr.msra.gmra.mrb[8].mxu0 %vm1204_vm1, %v4820_v57 }
 0x31c   : > { %3603 = vmatpush3.bf16.msra.mxu0 %v4815_v48  ;;  %3604 = vmatprep.mubr.msk.bf16.mxu0 %vm4292_vm0, %v4291_v17 }
 0x31d   : > { %3614 = vmatprep.subr.bf16.mxu0 %v4291_v17 }
 0x3e6   : > { %v1245_v60 = vpop.f32.mrb[4].mxu1 }
 0x3e7   : > { %v3588_v61 = vpop.f32.mrb[5].mxu1  ;;  %v1299_v23 = vmul.f32 0.17677669, %v1245_v60 }
 0x3e8   : > { %v1248_v62 = vpop.f32.mrb[6].mxu1 }
 0x3e9   : > { %v3589_v63 = vpop.f32.mrb[7].mxu1  ;;  %v1300_v21 = vmul.f32 0.17677669, %v1248_v62  ;;  %v1304_v25 = vsel %vm1303_vm2, %v1299_v23, -inf }
 0x3eb   : > { %v1307_v24 = vsel %vm1303_vm2, %v1300_v21, -inf }
 0x3ee   : > { %v1292_v0 = vpop.f32.mrb[8].mxu0 }
 0x3ef   : > { %v1301_v1 = vmul.f32 0.17677669, %v1292_v0  ;;  %v3594_v2 = vpop.f32.mrb[9].mxu0 }
 0x3f0   : > { %v1295_v3 = vpop.f32.mrb[10].mxu0 }
 0x3f1   : > { %v1302_v4 = vmul.f32 0.17677669, %v1295_v3  ;;  %v3595_v5 = vpop.f32.mrb[11].mxu0  ;;  %v1310_v6 = vsel %vm1303_vm2, %v1301_v1, -inf }
 0x3f2   : > { %1311 = vmax.xlane.f32.xlu0 %v1310_v6 }
 0x3f3   : > { %v1313_v7 = vsel %vm1303_vm2, %v1302_v4, -inf }
 0x3f4   : > { %1314 = vmax.xlane.f32.xlu1 %v1313_v7 }
 0x47f   : > { %v1312_v8 = vpop.xlane.xlu0 %1311 }
 0x480   : > { %v1318_v9 = vsub.f32 %v1301_v1, %v1312_v8 }
 0x481   : > { %v1315_v10 = vpop.xlane.xlu1 %1314 }
 0x482   : > { %v1324_v11 = vmul.f32 1.442695, %v1318_v9  ;;  %v1319_v12 = vsub.f32 %v1302_v4, %v1315_v10 }
 0x484   : > { %3932 = vpow2.f32 %v1324_v11  ;;  %v1326_v13 = vmul.f32 1.442695, %v1319_v12 }
 0x486   : > { %3934 = vpow2.f32 %v1326_v13 }
 0x48e   : > { %v3933_v14 = vpop.eup %3932 }
 0x48f   : > { %v1334_v15 = vsel %vm1303_vm2, %v3933_v14, 0.0 }
 0x490   : > { %v3935_v16 = vpop.eup %3934  ;;  %1335 = vadd.xlane.f32.xlu0 %v1334_v15 }
 0x491   : > { %v1337_v18 = vsel %vm1303_vm2, %v3935_v16, 0.0 }
 0x492   : > { %1338 = vadd.xlane.f32.xlu1 %v1337_v18 }
 0x4a3   : > { %1494 = vrot.lane.b32.xlu1 %v4820_v57, %s4293_s23 }
 0x4a6   : > { %1497 = vrot.lane.b32.xlu0 %v4822_v58, %s4293_s23 }
 0x4c5   : > { %1308 = vmax.xlane.f32.xlu0 %v1307_v24 }
 0x4c7   : > { %1305 = vmax.xlane.f32.xlu1 %v1304_v25 }
 0x51d   : > { %v1336_v26 = vpop.xlane.xlu0 %1335 }
 0x51e   : > { %3936 = vrcp.f32 %v1336_v26 }
 0x51f   : > { %v1339_v27 = vpop.xlane.xlu1 %1338 }
 0x520   : > { %3938 = vrcp.f32 %v1339_v27 }
 0x521   : > { %v1498_v32 = vpop.permute.xlu0 %1497 }
 0x522   : > { %v1503_v34 = vsel %vm1204_vm1, %v1498_v32, 0 }
 0x523   : > { %v1495_v35 = vpop.permute.xlu1 %1494 }
 0x528   : > { %v3937_v28 = vpop.eup %3936 }
 0x529   : > { %v1346_v30 = vmul.f32 %v3937_v28, %v3933_v14 }
 0x52a   : > { %v3939_v29 = vpop.eup %3938 }
 0x52b   : > { %v1347_v31 = vmul.f32 %v3939_v29, %v3935_v16 }
 0x52d   : > { %v1349_v33 = vpack.c.bf16 %v1347_v31, %v1346_v30 }
 0x52f   : > { %3605 = vmatmul.mubr.msk.bf16.vlgmr.msra.gmra.mrb[12].mxu0 %vm1303_vm2, %v1349_v33 }
 0x530   : > { %3615 = vmatpush3.bf16.xpose.msra.mxu0 %v1503_v34  ;;  %3616 = vmatprep.mubr.msk.bf16.mxu0 %vm4292_vm0, %v4291_v17 }
 0x531   : > { %3626 = vmatprep.subr.bf16.mxu0 %v4291_v17 }
 0x537   : > { %3617 = vmatmul.mubr.msk.bf16.vlgmr.msra.gmra.mrb[16].mxu0 %vm1204_vm1, %v1495_v35 }
 0x538   : > { %3628 = vmatprep.mubr.msk.bf16.mxu0 %vm4292_vm0, %v4291_v17 }
 0x552   : > { %v1309_v37 = vpop.xlane.xlu0 %1308 }
 0x553   : > { %v1317_v39 = vsub.f32 %v1300_v21, %v1309_v37 }
 0x554   : > { %v1306_v40 = vpop.xlane.xlu1 %1305 }
 0x555   : > { %v1322_v41 = vmul.f32 1.442695, %v1317_v39  ;;  %v1316_v42 = vsub.f32 %v1299_v23, %v1306_v40 }
 0x557   : > { %3940 = vpow2.f32 %v1322_v41  ;;  %v1320_v44 = vmul.f32 1.442695, %v1316_v42 }
 0x559   : > { %3942 = vpow2.f32 %v1320_v44 }
 0x561   : > { %v3941_v45 = vpop.eup %3940 }
 0x562   : > { %v1331_v46 = vsel %vm1303_vm2, %v3941_v45, 0.0 }
 0x563   : > { %v3943_v47 = vpop.eup %3942  ;;  %1332 = vadd.xlane.f32.xlu1 %v1331_v46 }
 0x564   : > { %v1328_v49 = vsel %vm1303_vm2, %v3943_v47, 0.0 }
 0x565   : > { %1329 = vadd.xlane.f32.xlu0 %v1328_v49 }
 0x574   : > { %1441 = vrot.lane.b32.xlu1 %v4809_v36, %s4293_s23 }
 0x57b   : > { %1444 = vrot.lane.b32.xlu0 %v4811_v38, %s4293_s23 }
 0x5f0   : > { %v1333_v51 = vpop.xlane.xlu1 %1332 }
 0x5f1   : > { %3944 = vrcp.f32 %v1333_v51 }
 0x5f2   : > { %v1330_v52 = vpop.xlane.xlu0 %1329 }
 0x5f3   : > { %3946 = vrcp.f32 %v1330_v52 }
 0x5f4   : > { %v1442_v3 = vpop.permute.xlu1 %1441 }
 0x5f6   : > { %v1445_v59 = vpop.permute.xlu0 %1444 }
 0x5f7   : > { %v1450_v61 = vsel %vm1204_vm1, %v1445_v59, 0 }
 0x5fb   : > { %v3945_v53 = vpop.eup %3944 }
 0x5fc   : > { %v1345_v55 = vmul.f32 %v3945_v53, %v3941_v45 }
 0x5fd   : > { %v3947_v54 = vpop.eup %3946 }
 0x5fe   : > { %v1344_v56 = vmul.f32 %v3947_v54, %v3943_v47 }
 0x600   : > { %v1348_v60 = vpack.c.bf16 %v1345_v55, %v1344_v56 }
 0x602   : > { %3599 = vmatmul.mubr.msk.bf16.vlgmr.msra.gmra.mrb[8].mxu1 %vm1303_vm2, %v1348_v60  ;;  %v4865_v62 = vpop.f32.mrb[12].mxu0 }
 0x603   : > { %3609 = vmatpush3.bf16.xpose.msra.mxu1 %v1450_v61  ;;  %v3606_v63 = vpop.f32.mrb[13].mxu0  ;;  %3610 = vmatprep.mubr.msk.bf16.mxu1 %vm4292_vm0, %v4291_v17 }
 0x604   : > { %v4869_v0 = vpop.f32.mrb[14].mxu0  ;;  %3620 = vmatprep.subr.bf16.mxu1 %v4291_v17 }
 0x605   : > { %v1439_v1 = vpack.c.bf16 %v4869_v0, %v4865_v62  ;;  %v3607_v2 = vpop.f32.mrb[15].mxu0 }
 0x60a   : > { %3611 = vmatmul.mubr.msk.bf16.vlgmr.msra.gmra.mrb[12].mxu1 %vm1204_vm1, %v1442_v3  ;;  %v1539_v4 = vpop.f32.mrb[16].mxu0 }
 0x60b   : > { %v1548_v5 = vmul.f32 0.17677669, %v1539_v4  ;;  %v3618_v6 = vpop.f32.mrb[17].mxu0  ;;  %3622 = vmatprep.mubr.msk.bf16.mxu1 %vm4292_vm0, %v4291_v17 }
 0x60c   : > { %v1542_v7 = vpop.f32.mrb[18].mxu0 }
 0x60d   : > { %v1549_v8 = vmul.f32 0.17677669, %v1542_v7  ;;  %v3619_v9 = vpop.f32.mrb[19].mxu0  ;;  %v1556_v10 = vsel %vm1303_vm2, %v1548_v5, -inf }
 0x60e   : > { %1557 = vmax.xlane.f32.xlu1 %v1556_v10 }
 0x60f   : > { %v1559_v11 = vsel %vm1303_vm2, %v1549_v8, -inf }
 0x610   : > { %1560 = vmax.xlane.f32.xlu0 %v1559_v11 }
 0x61f   : > { %1830 = vrot.lane.b32.xlu1 %v4811_v38, %s4294_s8 }
 0x69b   : > { %v1558_v12 = vpop.xlane.xlu1 %1557 }
 0x69c   : > { %v1564_v13 = vsub.f32 %v1548_v5, %v1558_v12 }
 0x69d   : > { %v1561_v14 = vpop.xlane.xlu0 %1560 }
 0x69e   : > { %v1570_v15 = vmul.f32 1.442695, %v1564_v13  ;;  %v1565_v16 = vsub.f32 %v1549_v8, %v1561_v14 }
 0x69f   : > { %v1831_v41 = vpop.permute.xlu1 %1830 }
 0x6a0   : > { %3948 = vpow2.f32 %v1570_v15  ;;  %v1572_v18 = vmul.f32 1.442695, %v1565_v16  ;;  %v1836_v54 = vsel %vm1204_vm1, %v1831_v41, 0 }
 0x6a2   : > { %3950 = vpow2.f32 %v1572_v18 }
 0x6aa   : > { %v3949_v21 = vpop.eup %3948 }
 0x6ab   : > { %v1580_v23 = vsel %vm1303_vm2, %v3949_v21, 0.0 }
 0x6ac   : > { %v3951_v24 = vpop.eup %3950  ;;  %1581 = vadd.xlane.f32.xlu0 %v1580_v23 }
 0x6ad   : > { %v1583_v25 = vsel %vm1303_vm2, %v3951_v24, 0.0 }
 0x6ae   : > { %1584 = vadd.xlane.f32.xlu1 %v1583_v25 }
 0x6bf   : > { %1828 = vrot.lane.b32.xlu1 %v4809_v36, %s4294_s8 }
 0x6c2   : > { %1645 = vrot.lane.b32.xlu0 %v4815_v48, %s4293_s23 }
 0x6c3   : > { %1881 = vrot.lane.b32.xlu1 %v4822_v58, %s4294_s8 }
 0x6c6   : > { %1879 = vrot.lane.b32.xlu0 %v4820_v57, %s4294_s8 }
 0x6d5   : > { %v4891_v26 = vpop.f32.mrb[8].mxu1 }
 0x6d6   : > { %v3600_v27 = vpop.f32.mrb[9].mxu1 }
 0x6d7   : > { %v4893_v28 = vpop.f32.mrb[10].mxu1 }
 0x6d8   : > { %v1438_v29 = vpack.c.bf16 %v4893_v28, %v4891_v26  ;;  %v3601_v30 = vpop.f32.mrb[11].mxu1 }
 0x6dd   : > { %v1486_v31 = vpop.f32.mrb[12].mxu1 }
 0x6de   : > { %v3612_v32 = vpop.f32.mrb[13].mxu1  ;;  %v1546_v37 = vmul.f32 0.17677669, %v1486_v31 }
 0x6df   : > { %v1489_v33 = vpop.f32.mrb[14].mxu1 }
 0x6e0   : > { %v1547_v34 = vmul.f32 0.17677669, %v1489_v33  ;;  %v3613_v35 = vpop.f32.mrb[15].mxu1  ;;  %v1550_v40 = vsel %vm1303_vm2, %v1546_v37, -inf }
 0x6e2   : > { %v1553_v39 = vsel %vm1303_vm2, %v1547_v34, -inf }
 0x6e5   : > { %1554 = vmax.xlane.f32.xlu0 %v1553_v39 }
 0x6e7   : > { %1551 = vmax.xlane.f32.xlu1 %v1550_v40 }
 0x6f8   : > { %1597 = vrot.lane.b32.xlu1 %v4817_v50, %s4293_s23 }
 0x739   : > { %v1582_v42 = vpop.xlane.xlu0 %1581 }
 0x73a   : > { %3952 = vrcp.f32 %v1582_v42 }
 0x73b   : > { %v1585_v44 = vpop.xlane.xlu1 %1584 }
 0x73c   : > { %3954 = vrcp.f32 %v1585_v44 }
 0x73d   : > { %v1646_v45 = vpop.permute.xlu0 %1645 }
 0x73e   : > { %3627 = vmatpush3.bf16.msra.mxu0 %v1646_v45 }
 0x73f   : > { %3648 = vmatprep.subr.bf16.mxu0 %v4291_v17  ;;  %v1829_v53 = vpop.permute.xlu1 %1828 }
 0x741   : > { %v1880_v59 = vpop.permute.xlu0 %1879 }
 0x743   : > { %v1882_v55 = vpop.permute.xlu1 %1881 }
 0x744   : > { %v3953_v46 = vpop.eup %3952  ;;  %v1887_v56 = vsel %vm1204_vm1, %v1882_v55, 0 }
 0x745   : > { %v1592_v49 = vmul.f32 %v3953_v46, %v3949_v21 }
 0x746   : > { %v3955_v47 = vpop.eup %3954 }
 0x747   : > { %v1593_v51 = vmul.f32 %v3955_v47, %v3951_v24 }
 0x749   : > { %v1595_v52 = vpack.c.bf16 %v1593_v51, %v1592_v49  ;;  %v3876_v49 = vld [vmem:[%s4681_s0 + $0x10] sm:$0xff]   ;;  %v3877_v51 = vld [vmem:[%s4681_s0 + $0x18] sm:$0xff]  }
 0x74b   : > { %3629 = vmatmul.mubr.msk.bf16.vlgmr.msra.gmra.mrb[20].mxu0 %vm1303_vm2, %v1595_v52  ;;  %v3878_v52 = vld [vmem:[%s4681_s0] sm:$0xff]  }
 0x74c   : > { %3649 = vmatpush3.bf16.xpose.msra.mxu0 %v1836_v54  ;;  %3650 = vmatprep.mubr.msk.bf16.mxu0 %vm4292_vm0, %v4291_v17 }
 0x74d   : > { %3654 = vmatprep.subr.bf16.mxu0 %v4291_v17 }
 0x753   : > { %3651 = vmatmul.mubr.msk.bf16.vlgmr.msra.gmra.mrb[24].mxu0 %vm1204_vm1, %v1829_v53 }
 0x754   : > { %3655 = vmatpush3.bf16.xpose.msra.mxu0 %v1887_v56  ;;  %3656 = vmatprep.mubr.msk.bf16.mxu0 %vm4292_vm0, %v4291_v17 }
 0x755   : > { %3666 = vmatprep.subr.bf16.mxu0 %v4291_v17 }
 0x75b   : > { %3657 = vmatmul.mubr.msk.bf16.vlgmr.msra.gmra.mrb[28].mxu0 %vm1204_vm1, %v1880_v59 }
 0x75c   : > { %3668 = vmatprep.mubr.msk.bf16.mxu0 %vm4292_vm0, %v4291_v17 }
 0x772   : > { %v1555_v60 = vpop.xlane.xlu0 %1554 }
 0x773   : > { %v1563_v61 = vsub.f32 %v1547_v34, %v1555_v60 }
 0x774   : > { %v1552_v63 = vpop.xlane.xlu1 %1551 }
 0x775   : > { %v1562_v2 = vsub.f32 %v1546_v37, %v1552_v63  ;;  %v1568_v3 = vmul.f32 1.442695, %v1563_v61 }
 0x777   : > { %v1566_v4 = vmul.f32 1.442695, %v1562_v2 }
 0x778   : > { %v1598_v5 = vpop.permute.xlu1 %1597 }
 0x779   : > { %3956 = vpow2.f32 %v1566_v4  ;;  %3621 = vmatpush3.bf16.msra.mxu1 %v1598_v5 }
 0x77a   : > { %3958 = vpow2.f32 %v1568_v3  ;;  %3632 = vmatprep.subr.bf16.mxu1 %v3876_v49 }
 0x783   : > { %v3957_v6 = vpop.eup %3956 }
 0x784   : > { %v1574_v7 = vsel %vm1303_vm2, %v3957_v6, 0.0  ;;  %v3959_v8 = vpop.eup %3958 }
 0x785   : > { %1575 = vadd.xlane.f32.xlu0 %v1574_v7  ;;  %v1577_v9 = vsel %vm1303_vm2, %v3959_v8, 0.0 }
 0x789   : > { %1578 = vadd.xlane.f32.xlu0 %v1577_v9 }
 0x812   : > { %v1576_v10 = vpop.xlane.xlu0 %1575 }
 0x813   : > { %3960 = vrcp.f32 %v1576_v10 }
 0x816   : > { %v1579_v11 = vpop.xlane.xlu0 %1578 }
 0x817   : > { %3962 = vrcp.f32 %v1579_v11 }
 0x81d   : > { %v3961_v13 = vpop.eup %3960 }
 0x81e   : > { %v4917_v12 = vpop.f32.mrb[20].mxu0  ;;  %v1590_v23 = vmul.f32 %v3961_v13, %v3957_v6 }
 0x81f   : > { %v3630_v14 = vpop.f32.mrb[21].mxu0 }
 0x820   : > { %v4919_v15 = vpop.f32.mrb[22].mxu0 }
 0x821   : > { %v3963_v16 = vpop.eup %3962  ;;  %v1693_v18 = vpack.c.bf16 %v4919_v15, %v4917_v12  ;;  %v3631_v21 = vpop.f32.mrb[23].mxu0 }
 0x822   : > { %v1591_v24 = vmul.f32 %v3963_v16, %v3959_v8 }
 0x824   : > { %v1594_v25 = vpack.c.bf16 %v1591_v24, %v1590_v23 }
 0x826   : > { %3623 = vmatmul.mubr.msk.bf16.vlgmr.msra.gmra.mrb[16].mxu1 %vm1303_vm2, %v1594_v25  ;;  %v1872_v27 = vpop.f32.mrb[24].mxu0 }
 0x827   : > { %v1930_v30 = vmul.f32 0.17677669, %v1872_v27  ;;  %v3652_v31 = vpop.f32.mrb[25].mxu0  ;;  %3633 = vmatpush3.bf16.msra.mxu1 %v3876_v49  ;;  %v3879_v27 = vld [vmem:[%s4681_s0 + $0x8] sm:$0xff]  }
 0x828   : > { %v1875_v32 = vpop.f32.mrb[26].mxu0  ;;  %3634 = vmatprep.subr.bf16.mxu1 %v3877_v51 }
 0x829   : > { %v1931_v33 = vmul.f32 0.17677669, %v1875_v32  ;;  %v3653_v34 = vpop.f32.mrb[27].mxu0  ;;  %v1934_v35 = vsel %vm1303_vm2, %v1930_v30, -inf }
 0x82a   : > { %1935 = vmax.xlane.f32.xlu0 %v1934_v35 }
 0x82b   : > { %v1937_v37 = vsel %vm1303_vm2, %v1931_v33, -inf  ;;  %3635 = vmatpush3.bf16.msra.mxu1 %v3877_v51 }
 0x82c   : > { %3640 = vmatprep.subr.bf16.mxu1 %v3878_v52 }
 0x82e   : > { %1938 = vmax.xlane.f32.xlu0 %v1937_v37  ;;  %v1923_v39 = vpop.f32.mrb[28].mxu0 }
 0x82f   : > { %v1932_v40 = vmul.f32 0.17677669, %v1923_v39  ;;  %v3658_v41 = vpop.f32.mrb[29].mxu0 }
 0x830   : > { %v1926_v42 = vpop.f32.mrb[30].mxu0 }
 0x831   : > { %v1933_v44 = vmul.f32 0.17677669, %v1926_v42  ;;  %v3659_v45 = vpop.f32.mrb[31].mxu0  ;;  %v1940_v46 = vsel %vm1303_vm2, %v1932_v40, -inf }
 0x832   : > { %1941 = vmax.xlane.f32.xlu0 %v1940_v46 }
 0x833   : > { %v1943_v47 = vsel %vm1303_vm2, %v1933_v44, -inf }
 0x836   : > { %1944 = vmax.xlane.f32.xlu0 %v1943_v47 }
 0x8b7   : > { %v1936_v53 = vpop.xlane.xlu0 %1935 }
 0x8b8   : > { %v1946_v54 = vsub.f32 %v1930_v30, %v1936_v53 }
 0x8ba   : > { %v1950_v55 = vmul.f32 1.442695, %v1946_v54 }
 0x8bb   : > { %v1939_v56 = vpop.xlane.xlu0 %1938 }
 0x8bc   : > { %3964 = vpow2.f32 %v1950_v55  ;;  %v1947_v59 = vsub.f32 %v1931_v33, %v1939_v56 }
 0x8be   : > { %v1952_v60 = vmul.f32 1.442695, %v1947_v59 }
 0x8bf   : > { %v1942_v61 = vpop.xlane.xlu0 %1941 }
 0x8c0   : > { %3966 = vpow2.f32 %v1952_v60  ;;  %v1948_v63 = vsub.f32 %v1932_v40, %v1942_v61  ;;  %v3881_v40 = vld [vmem:[%s4681_s0 + $0x28] sm:$0xff]  }
 0x8c2   : > { %v1954_v2 = vmul.f32 1.442695, %v1948_v63 }
 0x8c3   : > { %v1945_v3 = vpop.xlane.xlu0 %1944 }
 0x8c4   : > { %3968 = vpow2.f32 %v1954_v2  ;;  %v1949_v4 = vsub.f32 %v1933_v44, %v1945_v3 }
 0x8c6   : > { %v3965_v5 = vpop.eup %3964  ;;  %v1956_v6 = vmul.f32 1.442695, %v1949_v4 }
 0x8c7   : > { %v1958_v7 = vsel %vm1303_vm2, %v3965_v5, 0.0 }
 0x8c8   : > { %3970 = vpow2.f32 %v1956_v6  ;;  %1959 = vadd.xlane.f32.xlu1 %v1958_v7 }
 0x8ca   : > { %v3967_v8 = vpop.eup %3966 }
 0x8cb   : > { %v1961_v9 = vsel %vm1303_vm2, %v3967_v8, 0.0 }
 0x8cc   : > { %1962 = vadd.xlane.f32.xlu0 %v1961_v9 }
 0x8ce   : > { %v3969_v10 = vpop.eup %3968 }
 0x8cf   : > { %v1964_v11 = vsel %vm1303_vm2, %v3969_v10, 0.0 }
 0x8d0   : > { %1965 = vadd.xlane.f32.xlu0 %v1964_v11 }
 0x8d2   : > { %v3971_v13 = vpop.eup %3970 }
 0x8d3   : > { %v1967_v14 = vsel %vm1303_vm2, %v3971_v13, 0.0 }
 0x8d4   : > { %1968 = vadd.xlane.f32.xlu0 %v1967_v14 }
 0x8d9   : > { %2027 = vrot.lane.b32.xlu1 %v4815_v48, %s4294_s8 }
 0x8ea   : > { %1980 = vrot.lane.b32.xlu0 %v4817_v50, %s4294_s8 }
 0x8ee   : > { %2149 = vrot.lane.b32.xlu0 %v4811_v38, %s4295_s13 }
 0x8f2   : > { %2200 = vrot.lane.b32.xlu0 %v4822_v58, %s4295_s13 }
 0x8f6   : > { %2147 = vrot.lane.b32.xlu0 %v4809_v36, %s4295_s13 }
 0x8f9   : > { %v1637_v16 = vpop.f32.mrb[16].mxu1 }
 0x8fa   : > { %v3624_v21 = vpop.f32.mrb[17].mxu1  ;;  %2198 = vrot.lane.b32.xlu0 %v4820_v57, %s4295_s13 }
 0x8fb   : > { %v1640_v23 = vpop.f32.mrb[18].mxu1 }
 0x8fc   : > { %v1692_v24 = vpack.c.bf16 %v1640_v23, %v1637_v16  ;;  %v3625_v25 = vpop.f32.mrb[19].mxu1 }
 0x8fe   : > { %3636 = vmatprep.mubr.msk.bf16.mxu1 %vm1204_vm1, %v1692_v24 }
 0x8ff   : > { %3637 = vmatmul.mubr.msk.bf16.vlgmr.msra.gmra.mrb[20].mxu1 %vm1204_vm1, %v1693_v18 }
 0x900   : > { %3644 = vmatprep.mubr.msk.bf16.mxu1 %vm1204_vm1, %v1438_v29  ;;  %3641 = vmatpush3.bf16.msra.mxu1 %v3878_v52  ;;  %v3880_v29 = vld [vmem:[%s4681_s0 + $0x20] sm:$0xff]  }
 0x901   : > { %3642 = vmatprep.subr.bf16.mxu1 %v3879_v27 }
 0x904   : > { %3643 = vmatpush3.bf16.msra.mxu1 %v3879_v27 }
 0x905   : > { %3660 = vmatprep.subr.bf16.mxu1 %v4291_v17 }
 0x90b   : > { %3645 = vmatmul.mubr.msk.bf16.vlgmr.msra.gmra.mrb[20].mxu1 %vm1204_vm1, %v1439_v1 }
 0x90c   : > { %3662 = vmatprep.mubr.msk.bf16.mxu1 %vm4292_vm0, %v4291_v17 }
 0x955   : > { %v1960_v36 = vpop.xlane.xlu1 %1959 }
 0x956   : > { %3972 = vrcp.f32 %v1960_v36 }
 0x959   : > { %v2028_v38 = vpop.permute.xlu1 %2027  ;;  %v1963_v57 = vpop.xlane.xlu0 %1962 }
 0x95a   : > { %3974 = vrcp.f32 %v1963_v57  ;;  %3667 = vmatpush3.bf16.msra.mxu0 %v2028_v38 }
 0x95b   : > { %3680 = vmatprep.subr.bf16.mxu0 %v4291_v17 }
 0x95d   : > { %v1966_v58 = vpop.xlane.xlu0 %1965 }
 0x95e   : > { %3976 = vrcp.f32 %v1966_v58 }
 0x960   : > { %v3973_v28 = vpop.eup %3972 }
 0x961   : > { %v1969_v26 = vpop.xlane.xlu0 %1968  ;;  %v1974_v0 = vmul.f32 %v3973_v28, %v3965_v5 }
 0x962   : > { %3978 = vrcp.f32 %v1969_v26 }
 0x964   : > { %v3975_v62 = vpop.eup %3974 }
 0x965   : > { %v1975_v1 = vmul.f32 %v3975_v62, %v3967_v8  ;;  %v1981_v12 = vpop.permute.xlu0 %1980 }
 0x966   : > { %3661 = vmatpush3.bf16.msra.mxu1 %v1981_v12 }
 0x967   : > { %v1978_v15 = vpack.c.bf16 %v1975_v1, %v1974_v0  ;;  %3672 = vmatprep.subr.bf16.mxu1 %v3880_v29 }
 0x968   : > { %v3977_v18 = vpop.eup %3976 }
 0x969   : > { %3663 = vmatmul.mubr.msk.bf16.vlgmr.msra.gmra.mrb[24].mxu1 %vm1303_vm2, %v1978_v15  ;;  %v2150_v31 = vpop.permute.xlu0 %2149  ;;  %v1976_v32 = vmul.f32 %v3977_v18, %v3969_v10 }
 0x96a   : > { %3673 = vmatpush3.bf16.msra.mxu1 %v3880_v29  ;;  %v2155_v35 = vsel %vm1204_vm1, %v2150_v31, 0 }
 0x96b   : > { %3674 = vmatprep.subr.bf16.mxu1 %v3881_v40 }
 0x96c   : > { %v3979_v30 = vpop.eup %3978 }
 0x96d   : > { %v1977_v33 = vmul.f32 %v3979_v30, %v3971_v13  ;;  %v2201_v37 = vpop.permute.xlu0 %2200 }
 0x96e   : > { %3675 = vmatpush3.bf16.msra.mxu1 %v3881_v40  ;;  %v2206_v54 = vsel %vm1204_vm1, %v2201_v37, 0 }
 0x96f   : > { %v1979_v34 = vpack.c.bf16 %v1977_v33, %v1976_v32  ;;  %3686 = vmatprep.subr.bf16.mxu1 %v4291_v17 }
 0x971   : > { %3669 = vmatmul.mubr.msk.bf16.vlgmr.msra.gmra.mrb[32].mxu0 %vm1303_vm2, %v1979_v34  ;;  %v2148_v39 = vpop.permute.xlu0 %2147 }
 0x972   : > { %3681 = vmatpush3.bf16.xpose.msra.mxu0 %v2155_v35  ;;  %3682 = vmatprep.mubr.msk.bf16.mxu0 %vm4292_vm0, %v4291_v17 }
 0x973   : > { %3692 = vmatprep.subr.bf16.mxu0 %v4291_v17 }
 0x975   : > { %v2199_v3 = vpop.permute.xlu0 %2198 }
 0x979   : > { %3683 = vmatmul.mubr.msk.bf16.vlgmr.msra.gmra.mrb[36].mxu0 %vm1204_vm1, %v2148_v39 }
 0x97a   : > { %3694 = vmatprep.mubr.msk.bf16.mxu0 %vm4292_vm0, %v4291_v17 }
 0xa3c   : > { %v2020_v41 = vpop.f32.mrb[24].mxu1 }
 0xa3d   : > { %v3664_v42 = vpop.f32.mrb[25].mxu1 }
 0xa3e   : > { %v2023_v44 = vpop.f32.mrb[26].mxu1 }
 0xa3f   : > { %v2074_v45 = vpack.c.bf16 %v2023_v44, %v2020_v41  ;;  %v3665_v46 = vpop.f32.mrb[27].mxu1 }
 0xa40   : > { %v3882_v46 = vld [vmem:[%s4681_s0 + $0x30] sm:$0xff]  }
 0xa41   : > { %3676 = vmatprep.mubr.msk.bf16.mxu1 %vm1204_vm1, %v2074_v45 }
 0xa44   : > { %v2067_v47 = vpop.f32.mrb[32].mxu0 }
 0xa45   : > { %v3670_v49 = vpop.f32.mrb[33].mxu0 }
 0xa46   : > { %v2070_v51 = vpop.f32.mrb[34].mxu0 }
 0xa47   : > { %v2075_v52 = vpack.c.bf16 %v2070_v51, %v2067_v47  ;;  %v3671_v53 = vpop.f32.mrb[35].mxu0  ;;  %v3883_v47 = vld [vmem:[%s4681_s0 + $0x38] sm:$0xff]  }
 0xa49   : > { %3677 = vmatmul.mubr.msk.bf16.vlgmr.msra.gmra.mrb[20].mxu1 %vm1204_vm1, %v2075_v52 }
 0xa4a   : > { %3687 = vmatpush3.bf16.xpose.msra.mxu1 %v2206_v54  ;;  %3688 = vmatprep.mubr.msk.bf16.mxu1 %vm4292_vm0, %v4291_v17 }
 0xa4b   : > { %3698 = vmatprep.subr.bf16.mxu1 %v4291_v17 }
 0xa4c   : > { %v2191_v55 = vpop.f32.mrb[36].mxu0 }
 0xa4d   : > { %v2249_v56 = vmul.f32 0.17677669, %v2191_v55  ;;  %v3684_v59 = vpop.f32.mrb[37].mxu0 }
 0xa4e   : > { %v2194_v60 = vpop.f32.mrb[38].mxu0 }
 0xa4f   : > { %v2250_v61 = vmul.f32 0.17677669, %v2194_v60  ;;  %v3685_v63 = vpop.f32.mrb[39].mxu0  ;;  %v2253_v2 = vsel %vm1303_vm2, %v2249_v56, -inf }
 0xa50   : > { %2254 = vmax.xlane.f32.xlu0 %v2253_v2  ;;  %v3413_v2 = vld [vmem:[%s5242_s10] ss:$0 sm:$0xff] }
 0xa51   : > { %3689 = vmatmul.mubr.msk.bf16.vlgmr.msra.gmra.mrb[28].mxu1 %vm1204_vm1, %v2199_v3  ;;  %v2256_v4 = vsel %vm1303_vm2, %v2250_v61, -inf }
 0xa52   : > { %2257 = vmax.xlane.f32.xlu1 %v2256_v4  ;;  %3700 = vmatprep.mubr.msk.bf16.mxu1 %vm4292_vm0, %v4291_v17  ;;  %v4004_v4 = vld [vmem:[#allocation2] sm:$0xff] }
 0xadd   : > { %v2255_v5 = vpop.xlane.xlu0 %2254 }
 0xade   : > { %v2265_v6 = vsub.f32 %v2249_v56, %v2255_v5 }
 0xadf   : > { %v2258_v10 = vpop.xlane.xlu1 %2257 }
 0xae0   : > { %v2269_v7 = vmul.f32 1.442695, %v2265_v6  ;;  %v2266_v11 = vsub.f32 %v2250_v61, %v2258_v10 }
 0xae2   : > { %3980 = vpow2.f32 %v2269_v7  ;;  %v2271_v13 = vmul.f32 1.442695, %v2266_v11  ;;  %v4006_v11 = vld [vmem:[#allocation2 + $0x8] sm:$0xff] }
 0xae4   : > { %3982 = vpow2.f32 %v2271_v13 }
 0xaec   : > { %v3981_v8 = vpop.eup %3980 }
 0xaed   : > { %v2277_v9 = vsel %vm1303_vm2, %v3981_v8, 0.0 }
 0xaee   : > { %2278 = vadd.xlane.f32.xlu1 %v2277_v9  ;;  %v3983_v36 = vpop.eup %3982 }
 0xaef   : > { %v2280_v38 = vsel %vm1303_vm2, %v3983_v36, 0.0 }
 0xb24   : > { %v2242_v14 = vpop.f32.mrb[28].mxu1 }
 0xb25   : > { %v2251_v16 = vmul.f32 0.17677669, %v2242_v14  ;;  %v3690_v21 = vpop.f32.mrb[29].mxu1  ;;  %v4007_v14 = vld [vmem:[#allocation2 + $0x18] sm:$0xff] }
 0xb26   : > { %v2245_v23 = vpop.f32.mrb[30].mxu1 }
 0xb27   : > { %v2252_v24 = vmul.f32 0.17677669, %v2245_v23  ;;  %v3691_v25 = vpop.f32.mrb[31].mxu1  ;;  %v2259_v17 = vsel %vm1303_vm2, %v2251_v16, -inf }
 0xb28   : > { %2260 = vmax.xlane.f32.xlu0 %v2259_v17  ;;  %v3884_v25 = vld [vmem:[%s4683_s2] ss:$8 sps:$4 sm:$0xff]   ;;  %v3886_v17 = vld [vmem:[%s4683_s2 + $0x4] ss:$8 sps:$4 sm:$0xff]  }
 0xb29   : > { %v2262_v27 = vsel %vm1303_vm2, %v2252_v24, -inf }
 0xb2c   : > { %2263 = vmax.xlane.f32.xlu0 %v2262_v27  ;;  %v3889_v27 = vld [vmem:[%s4683_s2 + $0x14] ss:$8 sps:$4 sm:$0xff]  }
 0xb30   : > { %2281 = vadd.xlane.f32.xlu0 %v2280_v38 }
 0xb7b   : > { %v2279_v30 = vpop.xlane.xlu1 %2278 }
 0xbb5   : > { %v2261_v57 = vpop.xlane.xlu0 %2260 }
 0xbb6   : > { %v2267_v58 = vsub.f32 %v2251_v16, %v2261_v57 }
 0xbb8   : > { %v2273_v26 = vmul.f32 1.442695, %v2267_v58 }
 0xbb9   : > { %v2264_v28 = vpop.xlane.xlu0 %2263 }
 0xbba   : > { %3984 = vpow2.f32 %v2273_v26  ;;  %v2268_v29 = vsub.f32 %v2252_v24, %v2264_v28 }
 0xbbc   : > { %v2275_v62 = vmul.f32 1.442695, %v2268_v29 }
 0xbbd   : > { %v2282_v18 = vpop.xlane.xlu0 %2281 }
 0xbbe   : > { %3986 = vpow2.f32 %v2275_v62 }
 0xbbf   : > { %3988 = vrcp.f32 %v2282_v18 }
 0xbc0   : > { %3990 = vrcp.f32 %v2279_v30 }
 0xbc4   : > { %v3985_v0 = vpop.eup %3984 }
 0xbc5   : > { %v2283_v1 = vsel %vm1303_vm2, %v3985_v0, 0.0 }
 0xbc6   : > { %2284 = vadd.xlane.f32.xlu1 %v2283_v1 }
 0xbc8   : > { %v3987_v12 = vpop.eup %3986 }
 0xbc9   : > { %v2286_v15 = vsel %vm1303_vm2, %v3987_v12, 0.0  ;;  %v3989_v31 = vpop.eup %3988 }
 0xbca   : > { %2287 = vadd.xlane.f32.xlu0 %v2286_v15  ;;  %v3991_v33 = vpop.eup %3990  ;;  %v2294_v34 = vmul.f32 %v3989_v31, %v3983_v36  ;;  %v3887_v36 = vld [vmem:[%s4683_s2 + $0x10] ss:$8 sps:$4 sm:$0xff]  }
 0xbcb   : > { %v2293_v35 = vmul.f32 %v3991_v33, %v3981_v8  ;;  %v4005_v8 = vld [vmem:[#allocation2 + $0x10] sm:$0xff] }
 0xbd7   : > { %2299 = vrot.lane.b32.xlu1 %v4817_v50, %s4295_s13  ;;  %v2297_v50 = vpack.c.bf16 %v2294_v34, %v2293_v35  ;;  %v3892_v34 = vld [vmem:[%s4683_s2 + $0x24] ss:$8 sps:$4 sm:$0xff]   ;;  %v3890_v35 = vld [vmem:[%s4683_s2 + $0x20] ss:$8 sps:$4 sm:$0xff]  }
 0xbe0   : > { %2346 = vrot.lane.b32.xlu0 %v4815_v48, %s4295_s13 }
 0xc53   : > { %v2285_v32 = vpop.xlane.xlu1 %2284 }
 0xc54   : > { %3992 = vrcp.f32 %v2285_v32 }
 0xc57   : > { %v2288_v37 = vpop.xlane.xlu0 %2287  ;;  %v2300_v39 = vpop.permute.xlu1 %2299 }
 0xc58   : > { %3994 = vrcp.f32 %v2288_v37  ;;  %3693 = vmatpush3.bf16.msra.mxu0 %v2300_v39  ;;  %v3895_v37 = vld [vmem:[%s4683_s2 + $0x34] ss:$8 sps:$4 sm:$0xff]   ;;  %v3893_v39 = vld [vmem:[%s4683_s2 + $0x30] ss:$8 sps:$4 sm:$0xff]  }
 0xc59   : > { %2657 = vmatprep.subr.bf16.mxu0 %v3886_v17 }
 0xc5b   : > { %v2347_v40 = vpop.permute.xlu0 %2346  ;;  %3695 = vmatmul.mubr.msk.bf16.vlgmr.msra.gmra.mrb[40].mxu0 %vm1303_vm2, %v2297_v50  ;;  %v3898_v50 = vld [vmem:[%s4683_s2 + $0x44] ss:$8 sps:$4 sm:$0xff]  }
 0xc5c   : > { %3699 = vmatpush3.bf16.msra.mxu1 %v2347_v40  ;;  %2689 = vmatprep.mubr.bf16.mxu0 %v4290_v43  ;;  %v3896_v40 = vld [vmem:[%s4683_s2 + $0x40] ss:$8 sps:$4 sm:$0xff]  }
 0xc5d   : > { %3704 = vmatprep.subr.bf16.mxu1 %v3882_v46  ;;  %2658 = vmatpush1.bf16.msra.mxu0 %v3884_v25  ;;  %v3414_v25 = vld [vmem:[%s806_s3] ss:$0 sm:$0xff] }
 0xc5e   : > { %v3993_v48 = vpop.eup %3992  ;;  %2659 = vmatprep.subr.bf16.mxu0 %v3889_v27 }
 0xc5f   : > { %v2295_v42 = vmul.f32 %v3993_v48, %v3985_v0  ;;  %v3901_v48 = vld [vmem:[%s4683_s2 + $0x54] ss:$8 sps:$4 sm:$0xff]  }
 0xc61   : > { %2660 = vmatpush1.bf16.msra.mxu0 %v3887_v36 }
 0xc62   : > { %v3995_v41 = vpop.eup %3994  ;;  %2661 = vmatprep.subr.bf16.mxu0 %v3892_v34 }
 0xc63   : > { %v2296_v44 = vmul.f32 %v3995_v41, %v3987_v12  ;;  %v3899_v41 = vld [vmem:[%s4683_s2 + $0x50] ss:$8 sps:$4 sm:$0xff]  }
 0xc65   : > { %v2298_v45 = vpack.c.bf16 %v2296_v44, %v2295_v42  ;;  %2662 = vmatpush1.bf16.msra.mxu0 %v3890_v35  ;;  %v3904_v42 = vld [vmem:[%s4683_s2 + $0x64] ss:$8 sps:$4 sm:$0xff]   ;;  %v3902_v44 = vld [vmem:[%s4683_s2 + $0x60] ss:$8 sps:$4 sm:$0xff]  }
 0xc66   : > { %2663 = vmatprep.subr.bf16.mxu0 %v3895_v37  ;;  %v3919_v35 = vld [vmem:[%s4689_s5 + $0x28] sm:$0xff]   ;;  %v3920_v37 = vld [vmem:[%s4689_s5 + $0x70] sm:$0xff]  }
 0xc67   : > { %3701 = vmatmul.mubr.msk.bf16.vlgmr.msra.gmra.mrb[32].mxu1 %vm1303_vm2, %v2298_v45  ;;  %v3907_v45 = vld [vmem:[%s4683_s2 + $0x74] ss:$8 sps:$4 sm:$0xff]  }
 0xc68   : > { %3705 = vmatpush3.bf16.msra.mxu1 %v3882_v46  ;;  %v3905_v46 = vld [vmem:[%s4683_s2 + $0x70] ss:$8 sps:$4 sm:$0xff]  }
 0xc69   : > { %3706 = vmatprep.subr.bf16.mxu1 %v3883_v47  ;;  %2664 = vmatpush1.bf16.msra.mxu0 %v3893_v39  ;;  %v3921_v39 = vld [vmem:[%s4689_s5 + $0x30] sm:$0xff]  }
 0xc6a   : > { %2665 = vmatprep.subr.bf16.mxu0 %v3898_v50  ;;  %v2565_v50 = vld [vmem:[%s4729_s30] sm:$0x3] }
 0xc6c   : > { %3707 = vmatpush3.bf16.msra.mxu1 %v3883_v47  ;;  %v3908_v47 = vld [vmem:[%s4689_s5 + $0x40] sm:$0xff]  }
 0xc6d   : > { %2666 = vmatpush1.bf16.msra.mxu0 %v3896_v40  ;;  %3526 = vmatprep.subr.bf16.mxu1 %v3908_v47  ;;  %v2570_v40 = vrot.slane %v2565_v50, %v939_v20 }
 0xc6e   : > { %2667 = vmatprep.subr.bf16.mxu0 %v3901_v48 }
 0xc71   : > { %2668 = vmatpush1.bf16.msra.mxu0 %v3899_v41 }
 0xc72   : > { %2669 = vmatprep.subr.bf16.mxu0 %v3904_v42 }
 0xc75   : > { %2670 = vmatpush1.bf16.msra.mxu0 %v3902_v44 }
 0xc76   : > { %2671 = vmatprep.subr.bf16.mxu0 %v3907_v45 }
 0xc79   : > { %2672 = vmatpush1.bf16.msra.mxu0 %v3905_v46 }
 0xd2e   : > { %v2339_v49 = vpop.f32.mrb[40].mxu0 }
 0xd2f   : > { %v3696_v51 = vpop.f32.mrb[41].mxu0 }
 0xd30   : > { %v2342_v52 = vpop.f32.mrb[42].mxu0  ;;  %v3910_v51 = vld [vmem:[%s4689_s5 + $0x48] sm:$0xff]  }
 0xd31   : > { %v2393_v53 = vpack.c.bf16 %v2342_v52, %v2339_v49  ;;  %v3697_v54 = vpop.f32.mrb[43].mxu0  ;;  %v3909_v49 = vld [vmem:[%s4689_s5] sm:$0xff]   ;;  %v3911_v52 = vld [vmem:[%s4689_s5 + $0x8] sm:$0xff]  }
 0xd32   : > { %v3913_v54 = vld [vmem:[%s4689_s5 + $0x10] sm:$0xff]  }
 0xd33   : > { %3708 = vmatprep.mubr.msk.bf16.mxu1 %vm1204_vm1, %v2393_v53  ;;  %v3912_v53 = vld [vmem:[%s4689_s5 + $0x50] sm:$0xff]  }
 0xd3a   : > { %v2386_v55 = vpop.f32.mrb[32].mxu1 }
 0xd3b   : > { %v3702_v56 = vpop.f32.mrb[33].mxu1 }
 0xd3c   : > { %v2389_v59 = vpop.f32.mrb[34].mxu1  ;;  %v3915_v56 = vld [vmem:[%s4689_s5 + $0x18] sm:$0xff]  }
 0xd3d   : > { %v2394_v60 = vpack.c.bf16 %v2389_v59, %v2386_v55  ;;  %v3703_v61 = vpop.f32.mrb[35].mxu1  ;;  %v3914_v55 = vld [vmem:[%s4689_s5 + $0x58] sm:$0xff]   ;;  %v3916_v59 = vld [vmem:[%s4689_s5 + $0x60] sm:$0xff]  }
 0xd3e   : > { %v3918_v61 = vld [vmem:[%s4689_s5 + $0x68] sm:$0xff]  }
 0xd3f   : > { %3709 = vmatmul.mubr.msk.bf16.vlgmr.msra.gmra.mrb[20].mxu1 %vm1204_vm1, %v2394_v60  ;;  %v3917_v60 = vld [vmem:[%s4689_s5 + $0x20] sm:$0xff]  }
 0xd40   : > { %3527 = vmatpush3.bf16.msra.mxu1 %v3909_v49 }
 0xd41   : > { %3528 = vmatprep.subr.bf16.mxu1 %v3910_v51 }
 0xd44   : > { %3529 = vmatpush3.bf16.msra.mxu1 %v3911_v52 }
 0xd45   : > { %3530 = vmatprep.subr.bf16.mxu1 %v3912_v53 }
 0xd48   : > { %3531 = vmatpush3.bf16.msra.mxu1 %v3913_v54 }
 0xd49   : > { %3532 = vmatprep.subr.bf16.mxu1 %v3914_v55 }
 0xd4c   : > { %3533 = vmatpush3.bf16.msra.mxu1 %v3915_v56 }
 0xd4d   : > { %3534 = vmatprep.subr.bf16.mxu1 %v3916_v59 }
 0xd50   : > { %3535 = vmatpush3.bf16.msra.mxu1 %v3917_v60 }
 0xd51   : > { %3536 = vmatprep.subr.bf16.mxu1 %v3918_v61 }
 0xd54   : > { %3537 = vmatpush3.bf16.msra.mxu1 %v3919_v35 }
 0xd55   : > { %3538 = vmatprep.subr.bf16.mxu1 %v3920_v37 }
 0xd58   : > { %3539 = vmatpush3.bf16.msra.mxu1 %v3921_v39 }
 0xe12   : > { %v3710_v63 = vpop.f32.mrb[20].mxu1 }
 0xe13   : > { %v2447_v3 = vpop.f32.mrb[21].mxu1  ;;  %v2468_v9 = vadd.f32 %v4005_v8, %v3710_v63 }
 0xe14   : > { %v2466_v5 = vadd.f32 %v4004_v4, %v2447_v3  ;;  %v3711_v6 = vpop.f32.mrb[22].mxu1 }
 0xe15   : > { %v2450_v7 = vpop.f32.mrb[23].mxu1  ;;  %v2469_v16 = vadd.f32 %v4007_v14, %v3711_v6  ;;  %v5015_v23 = vadd.f32 %v3413_v2, %v2468_v9 }
 0xe16   : > { %v5010_v10 = vadd.f32 %v3413_v2, %v2466_v5  ;;  %v2467_v13 = vadd.f32 %v4006_v11, %v2450_v7 }
 0xe17   : > { %v5018_v24 = vadd.f32 %v3413_v2, %v2469_v16 }
 0xe18   : > { %v5012_v21 = vadd.f32 %v3413_v2, %v2467_v13  ;;  %2483 = vadd.xlane.f32.xlu1 %v5010_v10 }
 0xe1a   : > { %2485 = vadd.xlane.f32.xlu0 %v5012_v21 }
 0xe1c   : > { %2487 = vadd.xlane.f32.xlu1 %v5015_v23 }
 0xe1e   : > { %2489 = vadd.xlane.f32.xlu0 %v5018_v24 }
 0xea5   : > { %v2484_v38 = vpop.xlane.xlu1 %2483 }
 0xea6   : > { %v2491_v57 = vmul.f32 0.0078125, %v2484_v38 }
 0xea7   : > { %v2486_v58 = vpop.xlane.xlu0 %2485 }
 0xea8   : > { %v5027_v26 = vsub.f32 %v5010_v10, %v2491_v57  ;;  %v2492_v28 = vmul.f32 0.0078125, %v2486_v58  ;;  %v3415_v58 = vld [vmem:[%s809_s24] ss:$0 sm:$0xff] }
 0xea9   : > { %v2488_v29 = vpop.xlane.xlu1 %2487 }
 0xeaa   : > { %v5030_v62 = vsub.f32 %v5012_v21, %v2492_v28  ;;  %v2493_v0 = vmul.f32 0.0078125, %v2488_v29  ;;  %v2499_v1 = vmul.f32 %v5027_v26, %v5027_v26 }
 0xeab   : > { %v2490_v12 = vpop.xlane.xlu0 %2489 }
 0xeac   : > { %v5035_v15 = vsub.f32 %v5015_v23, %v2493_v0  ;;  %v2494_v18 = vmul.f32 0.0078125, %v2490_v12  ;;  %2503 = vadd.xlane.f32.xlu1 %v2499_v1  ;;  %v2500_v30 = vmul.f32 %v5030_v62, %v5030_v62 }
 0xeae   : > { %v5040_v31 = vsub.f32 %v5018_v24, %v2494_v18  ;;  %2505 = vadd.xlane.f32.xlu0 %v2500_v30  ;;  %v2501_v32 = vmul.f32 %v5035_v15, %v5035_v15 }
 0xeb0   : > { %2507 = vadd.xlane.f32.xlu1 %v2501_v32  ;;  %v2502_v33 = vmul.f32 %v5040_v31, %v5040_v31 }
 0xeb2   : > { %2509 = vadd.xlane.f32.xlu0 %v2502_v33 }
 0xf39   : > { %v2504_v63 = vpop.xlane.xlu1 %2503 }
 0xf3a   : > { %v2511_v2 = vmul.f32 0.0078125, %v2504_v63 }
 0xf3b   : > { %v2506_v3 = vpop.xlane.xlu0 %2505 }
 0xf3c   : > { %v2515_v4 = vadd.f32 1e-05, %v2511_v2  ;;  %v2512_v5 = vmul.f32 0.0078125, %v2506_v3 }
 0xf3d   : > { %v2508_v6 = vpop.xlane.xlu1 %2507 }
 0xf3e   : > { %3996 = vrsqrt.f32 %v2515_v4  ;;  %v2516_v7 = vadd.f32 1e-05, %v2512_v5  ;;  %v2513_v8 = vmul.f32 0.0078125, %v2508_v6 }
 0xf3f   : > { %v2510_v9 = vpop.xlane.xlu0 %2509 }
 0xf40   : > { %3998 = vrsqrt.f32 %v2516_v7  ;;  %v2517_v11 = vadd.f32 1e-05, %v2513_v8  ;;  %v2514_v13 = vmul.f32 0.0078125, %v2510_v9 }
 0xf42   : > { %4000 = vrsqrt.f32 %v2517_v11  ;;  %v2518_v14 = vadd.f32 1e-05, %v2514_v13  ;;  %v3432_v11 = vld [vmem:[%s816_s16] ss:$0 sm:$0xff] }
 0xf44   : > { %4002 = vrsqrt.f32 %v2518_v14 }
 0xf48   : > { %v3997_v16 = vpop.eup %3996 }
 0xf49   : > { %v2523_v17 = vmul.f32 %v3997_v16, %v5027_v26 }
 0xf4a   : > { %v3999_v27 = vpop.eup %3998 }
 0xf4b   : > { %v2524_v36 = vmul.f32 %v3999_v27, %v5030_v62  ;;  %v2533_v38 = vmul.f32 %v3414_v25, %v2523_v17 }
 0xf4c   : > { %v4001_v57 = vpop.eup %4000 }
 0xf4d   : > { %v2534_v28 = vmul.f32 %v3414_v25, %v2524_v36  ;;  %v2543_v0 = vadd.f32 %v3415_v58, %v2533_v38  ;;  %v2525_v12 = vmul.f32 %v4001_v57, %v5035_v15  ;;  %v3922_v15 = vld [vmem:[%s4689_s5 + $0x78] sm:$0xff]  }
 0xf4e   : > { %v4003_v29 = vpop.eup %4002  ;;  %3540 = vmatprep.subr.bf16.mxu1 %v3922_v15 }
 0xf4f   : > { %v2544_v1 = vadd.f32 %v3415_v58, %v2534_v28  ;;  %v2526_v26 = vmul.f32 %v4003_v29, %v5040_v31  ;;  %v2535_v30 = vmul.f32 %v3414_v25, %v2525_v12  ;;  %v3923_v31 = vld [vmem:[%s4689_s5 + $0x38] sm:$0xff]  }
 0xf50   : > { %3541 = vmatpush3.bf16.msra.mxu1 %v3923_v31 }
 0xf51   : > { %v2547_v62 = vpack.c.bf16 %v2544_v1, %v2543_v0  ;;  %v2536_v18 = vmul.f32 %v3414_v25, %v2526_v26  ;;  %v2545_v33 = vadd.f32 %v3415_v58, %v2535_v30 }
 0xf53   : > { %2690 = vmatmul.mubr.bf16.vlgmr.msra.gmra.mrb[44].mxu0 %v2547_v62  ;;  %v2546_v32 = vadd.f32 %v3415_v58, %v2536_v18 }
 0xf54   : > { %2699 = vmatprep.mubr.bf16.mxu0 %v4290_v43  ;;  %v2574_v43 = vrot.slane %v2565_v50, %v943_v22 }
 0xf55   : > { %v2548_v34 = vpack.c.bf16 %v2546_v32, %v2545_v33 }
 0xf5b   : > { %2700 = vmatmul.mubr.bf16.gmra.mrb[48].mxu0 %v2548_v34 }
0x1026   : > { %v2691_v48 = vpop.f32.mrb[44].mxu0 }
0x1027   : > { %v2692_v41 = vadd.f32 %v2691_v48, %v2570_v40  ;;  %v2693_v42 = vpop.f32.mrb[45].mxu0 }
0x1028   : > { %v2694_v44 = vadd.f32 %v2693_v42, %v2574_v43  ;;  %v2695_v45 = vpop.f32.mrb[46].mxu0  ;;  %v4009_v42 = vld [vmem:[#allocation12 + $0x8] sm:$0xff] (!%p3449_p5)  }
0x1029   : > { %v2696_v46 = vadd.f32 %v2695_v45, %v2570_v40  ;;  %v2697_v47 = vpop.f32.mrb[47].mxu0  ;;  %v2710_v51 = vmax.f32 %v2692_v41, 0.0  ;;  %v4008_v41 = vld [vmem:[#allocation12] sm:$0xff] (!%p3449_p5)   ;;  %v4011_v45 = vld [vmem:[#allocation12 + $0x18] sm:$0xff] (!%p3449_p5)  }
0x102a   : > { %v2698_v49 = vadd.f32 %v2697_v47, %v2574_v43  ;;  %v2711_v53 = vmax.f32 %v2694_v44, 0.0  ;;  %3712 = vmatprep.subr.bf16.mxu0 (!%p3449_p5), %v4008_v41  ;;  %v4010_v44 = vld [vmem:[#allocation12 + $0x10] sm:$0xff] (!%p3449_p5)   ;;  %v4013_v47 = vld [vmem:[#allocation12 + $0x28] sm:$0xff] (!%p3449_p5)  }
0x102b   : > { %v2712_v52 = vmax.f32 %v2696_v46, 0.0  ;;  %3713 = vmatpush3.bf16.msra.mxu0 (!%p3449_p5), %v4008_v41  ;;  %v4012_v46 = vld [vmem:[#allocation12 + $0x20] sm:$0xff] (!%p3449_p5)  }
0x102c   : > { %v2713_v54 = vmax.f32 %v2698_v49, 0.0  ;;  %3714 = vmatprep.subr.bf16.mxu0 (!%p3449_p5), %v4009_v42  ;;  %v4014_v49 = vld [vmem:[#allocation12 + $0x30] sm:$0xff] (!%p3449_p5)  }
0x102d   : > { %v2718_v55 = vpack.c.bf16 %v2712_v52, %v2710_v51  ;;  %v4015_v51 = vld [vmem:[#allocation12 + $0x38] sm:$0xff] (!%p3449_p5)  }
0x102e   : > { %v2719_v56 = vpack.c.bf16 %v2713_v54, %v2711_v53  ;;  %v2701_v59 = vpop.f32.mrb[48].mxu0 }
0x102f   : > { %v2702_v60 = vadd.f32 %v2701_v59, %v2570_v40  ;;  %v2703_v20 = vpop.f32.mrb[49].mxu0  ;;  %3715 = vmatpush3.bf16.msra.mxu0 (!%p3449_p5), %v4009_v42 }
0x1030   : > { %v2704_v61 = vadd.f32 %v2703_v20, %v2574_v43  ;;  %v2705_v19 = vpop.f32.mrb[50].mxu0  ;;  %2889 = vmatprep.mubr.bf16.mxu1 %v2719_v56  ;;  %3716 = vmatprep.subr.bf16.mxu0 (!%p3449_p5), %v4010_v44 }
0x1031   : > { %v2706_v22 = vadd.f32 %v2705_v19, %v2570_v40  ;;  %v2707_v63 = vpop.f32.mrb[51].mxu0  ;;  %2890 = vmatmul.mubr.bf16.vlgmr.msra.gmra.mrb[36].mxu1 %v2718_v55  ;;  %v2714_v3 = vmax.f32 %v2702_v60, 0.0 }
0x1032   : > { %v2708_v2 = vadd.f32 %v2707_v63, %v2574_v43  ;;  %v2715_v5 = vmax.f32 %v2704_v61, 0.0 }
0x1033   : > { %v2716_v4 = vmax.f32 %v2706_v22, 0.0  ;;  %3717 = vmatpush3.bf16.msra.mxu0 (!%p3449_p5), %v4010_v44 }
0x1034   : > { %v2717_v6 = vmax.f32 %v2708_v2, 0.0  ;;  %3718 = vmatprep.subr.bf16.mxu0 (!%p3449_p5), %v4011_v45 }
0x1035   : > { %v2720_v7 = vpack.c.bf16 %v2716_v4, %v2714_v3  ;;  %v3450_v4 = vld [vmem:[%s5246_s1] ss:$0 sm:$0xff] (!%p3449_p5) }
0x1036   : > { %v2721_v8 = vpack.c.bf16 %v2717_v6, %v2715_v5 }
0x1037   : > { %3719 = vmatpush3.bf16.msra.mxu0 (!%p3449_p5), %v4011_v45 }
0x1038   : > { %2897 = vmatprep.mubr.bf16.mxu1 %v2721_v8  ;;  %3720 = vmatprep.subr.bf16.mxu0 (!%p3449_p5), %v4012_v46 }
0x1039   : > { %2898 = vmatmul.mubr.bf16.gmra.mrb[40].mxu1 %v2720_v7 }
0x103b   : > { %3721 = vmatpush3.bf16.msra.mxu0 (!%p3449_p5), %v4012_v46 }
0x103c   : > { %3722 = vmatprep.subr.bf16.mxu0 (!%p3449_p5), %v4013_v47 }
0x103f   : > { %3723 = vmatpush3.bf16.msra.mxu0 (!%p3449_p5), %v4013_v47 }
0x1040   : > { %3724 = vmatprep.subr.bf16.mxu0 (!%p3449_p5), %v4014_v49 }
0x1043   : > { %3725 = vmatpush3.bf16.msra.mxu0 (!%p3449_p5), %v4014_v49 }
0x1044   : > { %3726 = vmatprep.subr.bf16.mxu0 (!%p3449_p5), %v4015_v51 }
0x1047   : > { %3727 = vmatpush3.bf16.msra.mxu0 (!%p3449_p5), %v4015_v51 }
0x1104   : > { %v3542_v9 = vpop.f32.mrb[36].mxu1 }
0x1105   : > { %v3543_v13 = vpop.f32.mrb[37].mxu1 }
0x1106   : > { %v3544_v14 = vadd.f32 %v3543_v13, %v3542_v9  ;;  %v3545_v16 = vpop.f32.mrb[38].mxu1  ;;  %v3451_v9 = vld [vmem:[%s5247_s9] ss:$0 sm:$0xff] (!%p3449_p5) }
0x1107   : > { %v3546_v25 = vpop.f32.mrb[39].mxu1 }
0x1108   : > { %v2892_v17 = vadd.f32 %v3544_v14, %v3432_v11  ;;  %v3547_v27 = vadd.f32 %v3546_v25, %v3545_v16 }
0x110a   : > { %v2906_v36 = vadd.f32 %v2892_v17, %v5010_v10  ;;  %v2895_v38 = vadd.f32 %v3547_v27, %v3432_v11 }
0x110c   : > { %2910 = vst [vmem:[#allocation2] sm:$0xff] %v2906_v36  ;;  %v2907_v57 = vadd.f32 %v2895_v38, %v5012_v21  ;;  %v3548_v58 = vpop.f32.mrb[40].mxu1  ;;  %2920 = vadd.xlane.f32.xlu0 (!%p3449_p5), %v2906_v36 }
0x110d   : > { %v3549_v28 = vpop.f32.mrb[41].mxu1 }
0x110e   : > { %2911 = vst [vmem:[#allocation2 + $0x8] sm:$0xff] %v2907_v57  ;;  %v3550_v29 = vadd.f32 %v3549_v28, %v3548_v58  ;;  %v3551_v0 = vpop.f32.mrb[42].mxu1 }
0x110f   : > { %v3552_v1 = vpop.f32.mrb[43].mxu1 }
0x1110   : > { %v2900_v12 = vadd.f32 %v3550_v29, %v3432_v11  ;;  %v3553_v26 = vadd.f32 %v3552_v1, %v3551_v0  ;;  %2917 = sbr.rel (%p3449_p5) target bundleno = 4907 (0x132b), region = 120  ;;  %2922 = vadd.xlane.f32.xlu0 (!%p3449_p5), %v2907_v57  ;;  %v3452_v29 = vld [vmem:[%s5248_s14] ss:$0 sm:$0xff] (!%p3449_p5) }
0x1112   : > { %v2908_v62 = vadd.f32 %v2900_v12, %v5015_v23  ;;  %v2903_v18 = vadd.f32 %v3553_v26, %v3432_v11 }
0x1114   : > { %2912 = vst [vmem:[#allocation2 + $0x10] sm:$0xff] %v2908_v62  ;;  %v2909_v30 = vadd.f32 %v2903_v18, %v5018_v24  ;;  %2924 = vadd.xlane.f32.xlu1 (!%p3449_p5), %v2908_v62 }
0x1116   : > { %2913 = vst [vmem:[#allocation2 + $0x18] sm:$0xff] %v2909_v30 }
0x1118   : > { %2926 = vadd.xlane.f32.xlu1 %v2909_v30 }
0x1199   : > { %v2921_v10 = vpop.xlane.xlu0 %2920 }
0x119a   : > { %v2928_v32 = vmul.f32 0.0078125, %v2921_v10 }
0x119c   : > { %v2932_v34 = vsub.f32 %v2906_v36, %v2928_v32 }
0x119d   : > { %v2923_v23 = vpop.xlane.xlu0 %2922 }
0x119e   : > { %v2929_v39 = vmul.f32 0.0078125, %v2923_v23  ;;  %v2936_v15 = vmul.f32 %v2932_v34, %v2932_v34 }
0x11a0   : > { %v2933_v31 = vsub.f32 %v2907_v57, %v2929_v39  ;;  %2940 = vadd.xlane.f32.xlu0 %v2936_v15 }
0x11a1   : > { %v2925_v21 = vpop.xlane.xlu1 %2924 }
0x11a2   : > { %v2930_v33 = vmul.f32 0.0078125, %v2925_v21  ;;  %v2937_v43 = vmul.f32 %v2933_v31, %v2933_v31 }
0x11a4   : > { %v5104_v35 = vsub.f32 %v2908_v62, %v2930_v33  ;;  %2942 = vadd.xlane.f32.xlu1 %v2937_v43 }
0x11a5   : > { %v2927_v37 = vpop.xlane.xlu1 %2926 }
0x11a6   : > { %v2931_v24 = vmul.f32 0.0078125, %v2927_v37  ;;  %v2938_v40 = vmul.f32 %v5104_v35, %v5104_v35 }
0x11a8   : > { %v2935_v50 = vsub.f32 %v2909_v30, %v2931_v24  ;;  %2944 = vadd.xlane.f32.xlu0 %v2938_v40 }
0x11aa   : > { %v2939_v48 = vmul.f32 %v2935_v50, %v2935_v50 }
0x11ac   : > { %2946 = vadd.xlane.f32.xlu1 %v2939_v48 }
0x122d   : > { %v2941_v52 = vpop.xlane.xlu0 %2940 }
0x122e   : > { %v2948_v53 = vmul.f32 0.0078125, %v2941_v52 }
0x1230   : > { %v2952_v54 = vadd.f32 1e-05, %v2948_v53 }
0x1231   : > { %v2943_v55 = vpop.xlane.xlu1 %2942 }
0x1232   : > { %4016 = vrsqrt.f32 %v2952_v54  ;;  %v2949_v59 = vmul.f32 0.0078125, %v2943_v55 }
0x1234   : > { %v2953_v20 = vadd.f32 1e-05, %v2949_v59 }
0x1235   : > { %v2945_v56 = vpop.xlane.xlu0 %2944 }
0x1236   : > { %v2950_v60 = vmul.f32 0.0078125, %v2945_v56  ;;  %4018 = vrsqrt.f32 %v2953_v20 }
0x1238   : > { %v2954_v61 = vadd.f32 1e-05, %v2950_v60 }
0x1239   : > { %v2947_v19 = vpop.xlane.xlu1 %2946 }
0x123a   : > { %v2951_v22 = vmul.f32 0.0078125, %v2947_v19  ;;  %4020 = vrsqrt.f32 %v2954_v61 }
0x123c   : > { %v2955_v63 = vadd.f32 1e-05, %v2951_v22  ;;  %v4017_v2 = vpop.eup %4016 }
0x123d   : > { %v2960_v3 = vmul.f32 %v4017_v2, %v2932_v34 }
0x123e   : > { %4022 = vrsqrt.f32 %v2955_v63 }
0x123f   : > { %v2970_v8 = vmul.f32 %v3450_v4, %v2960_v3 }
0x1240   : > { %v4019_v5 = vpop.eup %4018 }
0x1241   : > { %v2961_v7 = vmul.f32 %v4019_v5, %v2933_v31  ;;  %v2980_v16 = vadd.f32 %v3451_v9, %v2970_v8 }
0x1243   : > { %v2971_v13 = vmul.f32 %v3450_v4, %v2961_v7 }
0x1244   : > { %v4021_v6 = vpop.eup %4020 }
0x1245   : > { %v2962_v11 = vmul.f32 %v4021_v6, %v5104_v35  ;;  %v2981_v25 = vadd.f32 %v3451_v9, %v2971_v13 }
0x1247   : > { %v2972_v27 = vmul.f32 %v3450_v4, %v2962_v11  ;;  %v2984_v36 = vpack.c.bf16 %v2981_v25, %v2980_v16 }
0x1248   : > { %v4023_v14 = vpop.eup %4022 }
0x1249   : > { %v2963_v17 = vmul.f32 %v4023_v14, %v2935_v50  ;;  %3728 = vmatprep.mubr.bf16.mxu0 %v2984_v36  ;;  %v2982_v57 = vadd.f32 %v3451_v9, %v2972_v27 }
0x124b   : > { %v2973_v38 = vmul.f32 %v3450_v4, %v2963_v17 }
0x124d   : > { %v2983_v58 = vadd.f32 %v3451_v9, %v2973_v38 }
0x124f   : > { %v2985_v28 = vpack.c.bf16 %v2983_v58, %v2982_v57 }
0x1251   : > { %3729 = vmatmul.mubr.bf16.vlgmr.msra.gmra.mrb[0].mxu0 %v2985_v28 }
0x1324   : > { %v3730_v0 = vpop.f32.mrb[0].mxu0 }
0x1325   : > { %v3100_v1 = vadd.f32 %v3730_v0, %v3452_v29  ;;  %v3091_v12 = vpop.f32.mrb[1].mxu0 }
0x1326   : > { %v3092_v26 = vadd.f32 %v3452_v29, %v3091_v12  ;;  %v3731_v62 = vpop.f32.mrb[2].mxu0 }
0x1327   : > { %3108 = vst [vmem:[#allocation14 + $0x10] sm:$0xff] %v3100_v1  ;;  %v3103_v18 = vadd.f32 %v3731_v62, %v3452_v29  ;;  %v3094_v30 = vpop.f32.mrb[3].mxu0 }
0x1328   : > { %3106 = vst [vmem:[#allocation14] sm:$0xff] %v3092_v26  ;;  %v3095_v10 = vadd.f32 %v3452_v29, %v3094_v30 }
0x1329   : > { %3109 = vst [vmem:[#allocation14 + $0x18] sm:$0xff] %v3103_v18 }
0x132a   : > { %3107 = vst [vmem:[#allocation14 + $0x8] sm:$0xff] %v3095_v10 }
0x132b PF: > { %p3793_p7 = scmp.eq.s32.totalorder %s4525_s17, 1  ;;  %s4296_s20 = smov [#allocation14]  }
0x132c   : > { %s3116_s6 = sshll.u32 %s4296_s20, 4  ;;  %s3117_s6 = int_to_ptr.vmem [resolvable:$true] %s3116_s6 }
0x132d   : > { %s4200_s12 = scalar_lea.vmem %s3117_s6, 512  ;;  %p4207_p1 = scmp.lt.s32.totalorder %s3117_s6, %s3117_s6 }
0x132e   : > { %p4201_p2 = scmp.ne.s32.totalorder %s3117_s6, %s4200_s12  ;;  %p4208_p6 = scmp.lt.s32.totalorder %s4200_s12, %s4200_s12 }
0x1330   : > { %p4202_p8 = pnand %p4201_p2, %p3793_p7  ;;  %p4209_p10 = por %p4208_p6, %p4207_p1 }
0x1332   : > { %p4203_p12 = pneg %p4202_p8 }
0x1334   : > { %p4210_p13 = pnand %p4209_p10, %p4203_p12 }
0x1336   : > { %4213 = shalt.err (!%p4210_p13)
}
0x1337   : > { %s5249_s13 = sld [smem:[#allocation38_spill]] }
0x133d   : > { %s4214_s29 = scalar_lea.hbm %s5249_s13, 512 }
0x133e   : > { %p4215_p3 = scmp.ne.s32.totalorder %s5249_s13, %s4214_s29  ;;  %p4220_p11 = scmp.lt.u32.totalorder %s4214_s29, %s5249_s13 }
0x1340   : > { %p4216_p9 = pnand %p4215_p3, %p3793_p7 }
0x1342   : > { %p4217_p4 = pneg %p4216_p9 }
0x1344   : > { %p4222_p0 = pnand %p4220_p11, %p4217_p4 }
0x1346   : > { %4225 = shalt.err (!%p4222_p0)
}
0x1347   : > { %s4297_s22 = smov 128   ;;  %s4298_s27 = smov 8  }
0x1348   : > { %3765 = dma.vmem_to_hbm [thread:$0]  (%p3793_p7), %s3117_s6, 512, %s5249_s13, [#allocation5], %s4297_s22, %s4297_s22, %s4298_s27  }
0x1349   : > { %4259 = dma.done.wait (%p3793_p7), [#allocation5], 512  }
0x134a   : > { %4261 = vsyncadd (%p3793_p7), [#allocation5], 4294966784 }
0x134b PF: > { %s5250_s27 = sld [smem:[#allocation21_spill]]  ;;  %s5251_s3 = sld [smem:[#allocation20_spill]] }
0x134c   : > { %s5252_s26 = sld [smem:[#allocation22_spill]]  ;;  %s5253_s24 = smov %s4268_s25 }
0x1351   : > { %p33_p5 = scmp.ge.s32.totalorder %s5250_s27, 4   ;;  %s5254_s25 = smov %s5251_s3 }
0x1353   :  { %35 = sbr.rel (!%p33_p5) target bundleno = 25 (0x19), region = 201 }
0x135a   :  { %3132 = vsyncpa [#allocation4], 1 }
0x135b   :  { %3134 = vsyncpa [#allocation4 + $0x1], 1 }
0x135c   :  { %3135 = vsyncpa [#allocation7], 1 }
0x135d   :  { %3137 = vsyncpa [#allocation7 + $0x1], 1 }
0x135e   :  { %3138 = vsyncpa [#allocation10], 1 }
0x135f   :  { %3140 = vsyncpa [#allocation10 + $0x1], 1 }
0x1360   :  { %3141 = vsyncpa [#allocation13], 1 }
0x1361   :  { %3142 = vsyncpa [#allocation5], 1 }
0x1362   :  { %3144 = vsyncpa [#allocation5 + $0x1], 1 }

</bundles_post_ra>
